<compile_context>
chip_gen: v5e
topology: v5e:2x2
jax: 0.10.0
libtpu: 0.0.40
codegen_flags: <defaults>
</compile_context>

<pallas_src>
import functools

import jax
import jax.numpy as jnp
from jax.experimental import pallas as pl
from jax.experimental.pallas import tpu as pltpu


def _layer_norm(x, w, b, eps=1e-5):
    mean = jnp.mean(x, axis=-1, keepdims=True)
    var = jnp.mean(jnp.square(x - mean), axis=-1, keepdims=True)
    return (x - mean) * jax.lax.rsqrt(var + eps) * w + b


# Row indices inside the packed per-layer vector slab (shape (8, max(3E, Hid))).
_R_B_IN, _R_B_OUT, _R_LN1W, _R_LN1B, _R_B1, _R_B2, _R_LN2W, _R_LN2B = range(8)


def fused_encoder_kernel(x_ref, mask_ref,
                         w_in_ref, w_out_ref, w1_ref, w2_ref, vec_ref,
                         o_ref,
                         *, seq_len, num_heads, hidden_dim):
    """All encoder layers for one block of batch elements.

    Grid = (batch_blocks, num_layers).  The output block (same block index for every
    layer) doubles as the VMEM-resident activation carry; HBM writeback happens once
    per batch block when the batch-block index changes.
    """
    l = pl.program_id(1)

    @pl.when(l == 0)
    def _load_x():
        o_ref[...] = x_ref[...].astype(jnp.float32)

    x = o_ref[...]                                   # (M, E) f32, M = bt * S
    M, E = x.shape
    S = seq_len
    Bt = M // S
    H = num_heads
    Dh = E // H
    Hid = hidden_dim
    scale = 1.0 / float(Dh) ** 0.5

    # Packed per-layer vectors (one DMA): biases + LayerNorm affine params.
    b_in = vec_ref[_R_B_IN:_R_B_IN + 1, :3 * E]      # (1, 3E)
    b_out = vec_ref[_R_B_OUT:_R_B_OUT + 1, :E]       # (1, E)
    ln1_w = vec_ref[_R_LN1W:_R_LN1W + 1, :E]
    ln1_b = vec_ref[_R_LN1B:_R_LN1B + 1, :E]
    b1 = vec_ref[_R_B1:_R_B1 + 1, :Hid]
    b2 = vec_ref[_R_B2:_R_B2 + 1, :E]
    ln2_w = vec_ref[_R_LN2W:_R_LN2W + 1, :E]
    ln2_b = vec_ref[_R_LN2B:_R_LN2B + 1, :E]

    x_bf = x.astype(jnp.bfloat16)

    # ---- QKV projection: one (M, E) x (E, 3E) bf16 MXU matmul, f32 accumulate ------
    qkv = jnp.dot(x_bf, w_in_ref[...],
                  preferred_element_type=jnp.float32) + b_in          # (M, 3E) f32
    q = (qkv[:, :E] * scale).astype(jnp.bfloat16)
    k = qkv[:, E:2 * E].astype(jnp.bfloat16)
    v = qkv[:, 2 * E:3 * E].astype(jnp.bfloat16)

    mask = mask_ref[...]                              # (Bt, 1, S) additive f32

    # ---- attention + out-projection, accumulated per head ---------------------------
    # Each head: batched (over batch-in-block) QK^T / softmax / PV, then its context
    # is multiplied directly by the matching (Dh, E) slice of W_out and accumulated.
    attn = None
    for h in range(H):
        c0 = h * Dh
        q_h = q[:, c0:c0 + Dh].reshape(Bt, S, Dh)
        k_h = k[:, c0:c0 + Dh].reshape(Bt, S, Dh)
        v_h = v[:, c0:c0 + Dh].reshape(Bt, S, Dh)

        s_h = jnp.einsum('bqd,bkd->bqk', q_h, k_h,
                         preferred_element_type=jnp.float32)           # (Bt, S, S)
        s_h = s_h + mask                                               # broadcast over q
        s_h = s_h - jnp.max(s_h, axis=-1, keepdims=True)
        p_h = jnp.exp(s_h)
        p_h = p_h * pl.reciprocal(jnp.sum(p_h, axis=-1, keepdims=True), approx=True)

        ctx_h = jnp.einsum('bqk,bkd->bqd', p_h.astype(jnp.bfloat16), v_h,
                           preferred_element_type=jnp.float32)         # (Bt, S, Dh)

        part = jnp.dot(ctx_h.reshape(M, Dh).astype(jnp.bfloat16),
                       w_out_ref[c0:c0 + Dh, :],
                       preferred_element_type=jnp.float32)             # (M, E)
        attn = part if attn is None else attn + part
    attn = attn + b_out

    # ---- residual + LayerNorm 1 (f32) -----------------------------------------------
    y = _layer_norm(x + attn, ln1_w, ln1_b)

    # ---- feed-forward: bf16 MXU, f32 accumulate; cast to bf16 right after ReLU ------
    h_bf = jnp.maximum(
        jnp.dot(y.astype(jnp.bfloat16), w1_ref[...],
                preferred_element_type=jnp.float32) + b1, 0.0).astype(jnp.bfloat16)
    ffn = jnp.dot(h_bf, w2_ref[...],
                  preferred_element_type=jnp.float32) + b2

    # ---- residual + LayerNorm 2 (f32); write carry (resident in VMEM across l) ------
    o_ref[...] = _layer_norm(y + ffn, ln2_w, ln2_b)


def _pick_block_batch(batch, seq, max_rows=768):
    """Largest divisor bt of `batch` with bt*seq <= max_rows and a legal block shape.

    Block rows bt*seq must be a multiple of 8 (sublane constraint) unless the block
    covers the full (batch*seq) extent.  A bigger block raises arithmetic intensity
    per streamed weight byte and shrinks batch_blocks = B // bt, which directly
    multiplies total weight HBM traffic.  (On v7x one may prefer batch_blocks >= 2 so
    both TensorCores are used -- tune max_rows accordingly.)
    """
    best = None
    for cand in range(1, batch + 1):
        if batch % cand:
            continue
        rows = cand * seq
        if rows % 8 != 0 and cand != batch:
            continue
        if rows <= max_rows:
            best = cand
    if best is None:
        best = batch            # full-array block is always shape-legal
    return best


def _vmem_limit_bytes(bt, S, E, Hid):
    """Explicit scoped-VMEM budget: 2x double-buffered per-layer bf16 weight slab +
    packed vector slab + mask + activation block (input + resident output) + live
    intermediates, then 2x headroom.  Clamped to [32 MiB, 64 MiB]: 64 MiB is safe on
    every chip (v7x physical VMEM); on v6e/v5e (128 MiB physical) raise towards
    ~100 MiB if larger blocks are wanted."""
    M = bt * S
    W = max(3 * E, Hid)
    weight_slab = 2 * (3 * E * E + E * E + 2 * E * Hid)       # bf16 bytes per layer
    vec_slab = 8 * W * 4
    mask = bt * S * 4
    acts = 2 * (M * E * 4)                                    # input block + resident out
    live = M * 3 * E * 4 + M * Hid * 2 + bt * S * S * 4 + 3 * M * E * 4
    est = 2 * (weight_slab + vec_slab + mask) + 2 * acts + live
    return int(min(max(2 * est, 32 * 2 ** 20), 64 * 2 ** 20))


def run_transformer_encoder(x, mask_add, params, num_heads, block_batch=None):
    """x: (B, S, E) f32; mask_add: (B, S) additive f32 key-padding mask."""
    B, S, E = x.shape
    L = params["w_in"].shape[0]
    Hid = params["w1"].shape[2]
    W = params["vec"].shape[2]
    H = num_heads
    bt = _pick_block_batch(B, S) if block_batch is None else block_batch
    assert B % bt == 0

    x2d = x.reshape(B * S, E)                 # lane-dense 2-D activation layout
    mask3d = mask_add.reshape(B, 1, S)        # broadcast over heads happens in-kernel

    def layer_spec(r, c):
        return pl.BlockSpec((None, r, c), lambda b, l: (l, 0, 0))

    in_specs = [
        pl.BlockSpec((bt * S, E), lambda b, l: (b, 0)),     # activations (per batch block)
        pl.BlockSpec((bt, 1, S), lambda b, l: (b, 0, 0)),   # additive key-padding mask
        layer_spec(E, 3 * E),                               # in_proj weight  (bf16, (in,out))
        layer_spec(E, E),                                   # out_proj weight (bf16, (in,out))
        layer_spec(E, Hid),                                 # linear1 weight  (bf16, (in,out))
        layer_spec(Hid, E),                                 # linear2 weight  (bf16, (in,out))
        layer_spec(8, W),                                   # packed biases + LN params (f32)
    ]

    out2d = pl.pallas_call(
        functools.partial(fused_encoder_kernel, seq_len=S, num_heads=H, hidden_dim=Hid),
        out_shape=jax.ShapeDtypeStruct((B * S, E), jnp.float32),
        grid=(B // bt, L),
        in_specs=in_specs,
        out_specs=pl.BlockSpec((bt * S, E), lambda b, l: (b, 0)),
        compiler_params=pltpu.CompilerParams(
            dimension_semantics=("parallel", "arbitrary"),
            vmem_limit_bytes=_vmem_limit_bytes(bt, S, E, Hid)),
    )(x2d, mask3d,
      params["w_in"], params["w_out"], params["w1"], params["w2"], params["vec"])

    return out2d.reshape(B, S, E)


def _text_encoder_forward(params, embeddings, src_key_padding_mask, *, num_heads):
    # embeddings: (B, S, E); src_key_padding_mask: (B, S) bool, True == pad.
    mask_add = jnp.where(src_key_padding_mask, -1e9, 0.0).astype(jnp.float32)
    x = embeddings.astype(jnp.float32)
    y = run_transformer_encoder(x, mask_add, params, num_heads)     # (B, S, E)
    # PyTorch returns the seq-first tensor (S, B, E).
    return jnp.transpose(y, (1, 0, 2))


class TextEncoder:
    """JAX/Pallas port of the PyTorch TextEncoder (deterministic synthetic init)."""

    def __init__(self, embedding_dim, hidden_dim, num_layers, num_heads,
                 output_dim=512, key=None):
        assert embedding_dim % num_heads == 0
        self.num_heads = num_heads
        E, Hid, L = embedding_dim, hidden_dim, num_layers
        W = max(3 * E, Hid)
        if key is None:
            key = jax.random.PRNGKey(0)

        w_in, w_out, w1, w2, vecs = [], [], [], [], []
        for _ in range(L):
            key, k0, k1, k2, k3 = jax.random.split(key, 5)
            # Weights pre-transposed to (in, out) so the kernel never transposes.
            w_in.append((0.02 * jax.random.normal(k0, (3 * E, E), jnp.float32)).T)
            w_out.append((0.02 * jax.random.normal(k1, (E, E), jnp.float32)).T)
            w1.append((0.02 * jax.random.normal(k2, (Hid, E), jnp.float32)).T)
            w2.append((0.02 * jax.random.normal(k3, (E, Hid), jnp.float32)).T)

            # Packed per-layer vector slab: biases (zero) + LayerNorm affine (1, 0).
            vec = jnp.zeros((8, W), jnp.float32)
            vec = vec.at[_R_B_IN, :3 * E].set(jnp.zeros((3 * E,), jnp.float32))
            vec = vec.at[_R_B_OUT, :E].set(jnp.zeros((E,), jnp.float32))
            vec = vec.at[_R_LN1W, :E].set(jnp.ones((E,), jnp.float32))
            vec = vec.at[_R_LN1B, :E].set(jnp.zeros((E,), jnp.float32))
            vec = vec.at[_R_B1, :Hid].set(jnp.zeros((Hid,), jnp.float32))
            vec = vec.at[_R_B2, :E].set(jnp.zeros((E,), jnp.float32))
            vec = vec.at[_R_LN2W, :E].set(jnp.ones((E,), jnp.float32))
            vec = vec.at[_R_LN2B, :E].set(jnp.zeros((E,), jnp.float32))
            vecs.append(vec)

        stack = lambda xs: jnp.stack(xs, axis=0)
        self.params = {
            # MXU operands stored bf16 (halves DMA/VMEM); accumulation stays f32.
            "w_in": stack(w_in).astype(jnp.bfloat16),
            "w_out": stack(w_out).astype(jnp.bfloat16),
            "w1": stack(w1).astype(jnp.bfloat16),
            "w2": stack(w2).astype(jnp.bfloat16),
            "vec": stack(vecs),
        }

        # TODO(synk): self.fc exists in the PyTorch module but is never used in
        # forward(); params are created for parity only and never applied.
        key, kfc = jax.random.split(key)
        self.fc_w = 0.02 * jax.random.normal(kfc, (output_dim, E), jnp.float32)
        self.fc_b = jnp.zeros((output_dim,), jnp.float32)

        self._forward = jax.jit(
            functools.partial(_text_encoder_forward, num_heads=num_heads))

    def forward(self, embeddings, src_key_padding_mask):
        return self._forward(self.params, embeddings, src_key_padding_mask)

    __call__ = forward


if __name__ == "__main__":
    embedding_dim, hidden_dim, num_layers, num_heads = 32, 64, 2, 4
    batch, seq = 2, 8

    key = jax.random.PRNGKey(0)
    k_model, k_emb = jax.random.split(key)

    model = TextEncoder(embedding_dim, hidden_dim, num_layers, num_heads,
                        output_dim=512, key=k_model)

    embeddings = jax.random.normal(k_emb, (batch, seq, embedding_dim), jnp.float32)
    src_key_padding_mask = jnp.array(
        [[False] * seq,
         [False] * (seq - 3) + [True] * 3], dtype=jnp.bool_)

    out = model(embeddings, src_key_padding_mask)
    out = jax.block_until_ready(out)
    assert out.shape == (seq, batch, embedding_dim)
    assert bool(jnp.all(jnp.isfinite(out)))
    print("KERNEL_OK")
</pallas_src>

<mosaic_0001>
module attributes {stable_mosaic.version = 11 : i64} {
  func.func @fused_encoder_kernel(%arg0: i32, %arg1: i32, %arg2: memref<16x32xf32, #tpu.memory_space<vmem>>, %arg3: memref<2x1x8xf32, #tpu.memory_space<vmem>>, %arg4: memref<1x32x96xbf16, #tpu.memory_space<vmem>>, %arg5: memref<1x32x32xbf16, #tpu.memory_space<vmem>>, %arg6: memref<1x32x64xbf16, #tpu.memory_space<vmem>>, %arg7: memref<1x64x32xbf16, #tpu.memory_space<vmem>>, %arg8: memref<1x8x96xf32, #tpu.memory_space<vmem>>, %arg9: memref<16x32xf32, #tpu.memory_space<vmem>>) attributes {dimension_semantics = [#tpu.dimension_semantics<parallel>, #tpu.dimension_semantics<arbitrary>], iteration_bounds = array<i64: 1, 2>, scalar_prefetch = 0 : i64, scratch_operands = 0 : i64, tpu.core_type = #tpu.core_type<tc>, window_params = [{transform_indices = @transform_0, window_bounds = array<i64: 16, 32>}, {transform_indices = @transform_1, window_bounds = array<i64: 2, 1, 8>}, {transform_indices = @transform_2, window_bounds = array<i64: 1, 32, 96>}, {transform_indices = @transform_3, window_bounds = array<i64: 1, 32, 32>}, {transform_indices = @transform_4, window_bounds = array<i64: 1, 32, 64>}, {transform_indices = @transform_5, window_bounds = array<i64: 1, 64, 32>}, {transform_indices = @transform_6, window_bounds = array<i64: 1, 8, 96>}, {transform_indices = @transform_7, window_bounds = array<i64: 16, 32>}]} {
    %c0_i32 = arith.constant 0 : i32
    %0 = arith.cmpi eq, %arg1, %c0_i32 : i32
    %1 = arith.extui %0 : i1 to i32
    %c0_i32_0 = arith.constant 0 : i32
    %2 = arith.cmpi ne, %1, %c0_i32_0 : i32
    scf.if %2 {
      %c0_76 = arith.constant 0 : index
      %c0_77 = arith.constant 0 : index
      %205 = vector.load %arg2[%c0_76, %c0_77] : memref<16x32xf32, #tpu.memory_space<vmem>>, vector<16x32xf32>
      %c0_78 = arith.constant 0 : index
      %c0_79 = arith.constant 0 : index
      %206 = vector.load %arg9[%c0_78, %c0_79] : memref<16x32xf32, #tpu.memory_space<vmem>>, vector<16x32xf32>
      tpu.vector_store %arg9[%c0_78, %c0_79], %205 {strides = array<i32>} : memref<16x32xf32, #tpu.memory_space<vmem>>, vector<16x32xf32>,
    } else {
    }
    %c0 = arith.constant 0 : index
    %c0_1 = arith.constant 0 : index
    %3 = vector.load %arg9[%c0, %c0_1] : memref<16x32xf32, #tpu.memory_space<vmem>>, vector<16x32xf32>
    %c0_2 = arith.constant 0 : index
    %c0_3 = arith.constant 0 : index
    %c0_4 = arith.constant 0 : index
    %4 = vector.load %arg8[%c0_2, %c0_3, %c0_4] : memref<1x8x96xf32, #tpu.memory_space<vmem>>, vector<1x1x96xf32>
    %5 = vector.shape_cast %4 : vector<1x1x96xf32> to vector<1x96xf32>
    %c0_5 = arith.constant 0 : index
    %c1 = arith.constant 1 : index
    %c0_6 = arith.constant 0 : index
    %6 = vector.load %arg8[%c0_5, %c1, %c0_6] : memref<1x8x96xf32, #tpu.memory_space<vmem>>, vector<1x1x32xf32>
    %7 = vector.shape_cast %6 : vector<1x1x32xf32> to vector<1x32xf32>
    %c0_7 = arith.constant 0 : index
    %c2 = arith.constant 2 : index
    %c0_8 = arith.constant 0 : index
    %8 = vector.load %arg8[%c0_7, %c2, %c0_8] : memref<1x8x96xf32, #tpu.memory_space<vmem>>, vector<1x1x32xf32>
    %9 = vector.shape_cast %8 : vector<1x1x32xf32> to vector<1x32xf32>
    %c0_9 = arith.constant 0 : index
    %c3 = arith.constant 3 : index
    %c0_10 = arith.constant 0 : index
    %10 = vector.load %arg8[%c0_9, %c3, %c0_10] : memref<1x8x96xf32, #tpu.memory_space<vmem>>, vector<1x1x32xf32>
    %11 = vector.shape_cast %10 : vector<1x1x32xf32> to vector<1x32xf32>
    %c0_11 = arith.constant 0 : index
    %c4 = arith.constant 4 : index
    %c0_12 = arith.constant 0 : index
    %12 = vector.load %arg8[%c0_11, %c4, %c0_12] : memref<1x8x96xf32, #tpu.memory_space<vmem>>, vector<1x1x64xf32>
    %13 = vector.shape_cast %12 : vector<1x1x64xf32> to vector<1x64xf32>
    %c0_13 = arith.constant 0 : index
    %c5 = arith.constant 5 : index
    %c0_14 = arith.constant 0 : index
    %14 = vector.load %arg8[%c0_13, %c5, %c0_14] : memref<1x8x96xf32, #tpu.memory_space<vmem>>, vector<1x1x32xf32>
    %15 = vector.shape_cast %14 : vector<1x1x32xf32> to vector<1x32xf32>
    %c0_15 = arith.constant 0 : index
    %c6 = arith.constant 6 : index
    %c0_16 = arith.constant 0 : index
    %16 = vector.load %arg8[%c0_15, %c6, %c0_16] : memref<1x8x96xf32, #tpu.memory_space<vmem>>, vector<1x1x32xf32>
    %17 = vector.shape_cast %16 : vector<1x1x32xf32> to vector<1x32xf32>
    %c0_17 = arith.constant 0 : index
    %c7 = arith.constant 7 : index
    %c0_18 = arith.constant 0 : index
    %18 = vector.load %arg8[%c0_17, %c7, %c0_18] : memref<1x8x96xf32, #tpu.memory_space<vmem>>, vector<1x1x32xf32>
    %19 = vector.shape_cast %18 : vector<1x1x32xf32> to vector<1x32xf32>
    %20 = arith.truncf %3 : vector<16x32xf32> to vector<16x32xbf16>
    %c0_19 = arith.constant 0 : index
    %c0_20 = arith.constant 0 : index
    %c0_21 = arith.constant 0 : index
    %21 = vector.load %arg4[%c0_19, %c0_20, %c0_21] : memref<1x32x96xbf16, #tpu.memory_space<vmem>>, vector<1x32x96xbf16>
    %22 = vector.shape_cast %21 : vector<1x32x96xbf16> to vector<32x96xbf16>
    %cst = arith.constant dense<0.000000e+00> : vector<16x96xf32>
    %23 = tpu.matmul %20, %22, %cst {dimension_numbers = #tpu.dot_dimension_numbers<[1], [0], [0], [1], [0, 0, 1, 1], [], []>} : vector<16x32xbf16>, vector<32x96xbf16>, vector<16x96xf32> -> vector<16x96xf32>
    %24 = vector.broadcast %5 : vector<1x96xf32> to vector<16x96xf32>
    %25 = arith.addf %23, %24 : vector<16x96xf32>
    %26 = vector.extract_strided_slice %25 {offsets = [0, 0], sizes = [16, 32], strides = [1, 1]} : vector<16x96xf32> to vector<16x32xf32>
    %cst_22 = arith.constant 0.353553385 : f32
    %27 = vector.broadcast %cst_22 : f32 to vector<16x32xf32>
    %28 = arith.mulf %26, %27 : vector<16x32xf32>
    %29 = arith.truncf %28 : vector<16x32xf32> to vector<16x32xbf16>
    %30 = vector.extract_strided_slice %25 {offsets = [0, 32], sizes = [16, 32], strides = [1, 1]} : vector<16x96xf32> to vector<16x32xf32>
    %31 = arith.truncf %30 : vector<16x32xf32> to vector<16x32xbf16>
    %32 = vector.extract_strided_slice %25 {offsets = [0, 64], sizes = [16, 32], strides = [1, 1]} : vector<16x96xf32> to vector<16x32xf32>
    %33 = arith.truncf %32 : vector<16x32xf32> to vector<16x32xbf16>
    %c0_23 = arith.constant 0 : index
    %c0_24 = arith.constant 0 : index
    %c0_25 = arith.constant 0 : index
    %34 = vector.load %arg3[%c0_23, %c0_24, %c0_25] : memref<2x1x8xf32, #tpu.memory_space<vmem>>, vector<2x1x8xf32>
    %35 = vector.extract_strided_slice %29 {offsets = [0, 0], sizes = [16, 8], strides = [1, 1]} : vector<16x32xbf16> to vector<16x8xbf16>
    %36 = vector.shape_cast %35 : vector<16x8xbf16> to vector<2x8x8xbf16>
    %37 = vector.extract_strided_slice %31 {offsets = [0, 0], sizes = [16, 8], strides = [1, 1]} : vector<16x32xbf16> to vector<16x8xbf16>
    %38 = vector.shape_cast %37 : vector<16x8xbf16> to vector<2x8x8xbf16>
    %39 = vector.extract_strided_slice %33 {offsets = [0, 0], sizes = [16, 8], strides = [1, 1]} : vector<16x32xbf16> to vector<16x8xbf16>
    %40 = vector.shape_cast %39 : vector<16x8xbf16> to vector<2x8x8xbf16>
    "tpu.trace_start"() <{level = 10 : i32, message = "bqd,bkd->bqk"}> : () -> ()
    %cst_26 = arith.constant dense<0.000000e+00> : vector<2x8x8xf32>
    %41 = tpu.matmul %36, %38, %cst_26 {dimension_numbers = #tpu.dot_dimension_numbers<[2], [2], [1], [1], [0, 0, 0, 1, 1, 1], [0], [0]>} : vector<2x8x8xbf16>, vector<2x8x8xbf16>, vector<2x8x8xf32> -> vector<2x8x8xf32>
    "tpu.trace_stop"() : () -> ()
    %42 = vector.broadcast %34 : vector<2x1x8xf32> to vector<2x8x8xf32>
    %43 = arith.addf %41, %42 : vector<2x8x8xf32>
    %cst_27 = arith.constant dense<0xFF800000> : vector<2x8xf32>
    %44 = vector.multi_reduction <maximumf>, %43, %cst_27 [2] : vector<2x8x8xf32> to vector<2x8xf32>
    %45 = vector.shape_cast %44 : vector<2x8xf32> to vector<2x8x1xf32>
    %46 = vector.broadcast %45 : vector<2x8x1xf32> to vector<2x8x8xf32>
    %47 = arith.subf %43, %46 : vector<2x8x8xf32>
    %48 = math.exp %47 : vector<2x8x8xf32>
    %cst_28 = arith.constant dense<0.000000e+00> : vector<2x8xf32>
    %49 = vector.multi_reduction <add>, %48, %cst_28 [2] : vector<2x8x8xf32> to vector<2x8xf32>
    %50 = vector.shape_cast %49 : vector<2x8xf32> to vector<2x8x1xf32>
    %51 = tpu.reciprocal %50 {approx = true} : vector<2x8x1xf32> -> vector<2x8x1xf32>
    %52 = vector.broadcast %51 : vector<2x8x1xf32> to vector<2x8x8xf32>
    %53 = arith.mulf %48, %52 : vector<2x8x8xf32>
    %54 = arith.truncf %53 : vector<2x8x8xf32> to vector<2x8x8xbf16>
    "tpu.trace_start"() <{level = 10 : i32, message = "bqk,bkd->bqd"}> : () -> ()
    %cst_29 = arith.constant dense<0.000000e+00> : vector<2x8x8xf32>
    %55 = tpu.matmul %54, %40, %cst_29 {dimension_numbers = #tpu.dot_dimension_numbers<[2], [1], [1], [2], [0, 0, 0, 1, 1, 2], [0], [0]>} : vector<2x8x8xbf16>, vector<2x8x8xbf16>, vector<2x8x8xf32> -> vector<2x8x8xf32>
    "tpu.trace_stop"() : () -> ()
    %56 = vector.shape_cast %55 : vector<2x8x8xf32> to vector<16x8xf32>
    %57 = arith.truncf %56 : vector<16x8xf32> to vector<16x8xbf16>
    %c0_30 = arith.constant 0 : index
    %c0_31 = arith.constant 0 : index
    %c0_32 = arith.constant 0 : index
    %58 = vector.load %arg5[%c0_30, %c0_31, %c0_32] : memref<1x32x32xbf16, #tpu.memory_space<vmem>>, vector<1x8x32xbf16>
    %59 = vector.shape_cast %58 : vector<1x8x32xbf16> to vector<8x32xbf16>
    %cst_33 = arith.constant dense<0.000000e+00> : vector<16x32xf32>
    %60 = tpu.matmul %57, %59, %cst_33 {dimension_numbers = #tpu.dot_dimension_numbers<[1], [0], [0], [1], [0, 0, 1, 1], [], []>} : vector<16x8xbf16>, vector<8x32xbf16>, vector<16x32xf32> -> vector<16x32xf32>
    %61 = vector.extract_strided_slice %29 {offsets = [0, 8], sizes = [16, 8], strides = [1, 1]} : vector<16x32xbf16> to vector<16x8xbf16>
    %62 = vector.shape_cast %61 : vector<16x8xbf16> to vector<2x8x8xbf16>
    %63 = vector.extract_strided_slice %31 {offsets = [0, 8], sizes = [16, 8], strides = [1, 1]} : vector<16x32xbf16> to vector<16x8xbf16>
    %64 = vector.shape_cast %63 : vector<16x8xbf16> to vector<2x8x8xbf16>
    %65 = vector.extract_strided_slice %33 {offsets = [0, 8], sizes = [16, 8], strides = [1, 1]} : vector<16x32xbf16> to vector<16x8xbf16>
    %66 = vector.shape_cast %65 : vector<16x8xbf16> to vector<2x8x8xbf16>
    "tpu.trace_start"() <{level = 10 : i32, message = "bqd,bkd->bqk"}> : () -> ()
    %cst_34 = arith.constant dense<0.000000e+00> : vector<2x8x8xf32>
    %67 = tpu.matmul %62, %64, %cst_34 {dimension_numbers = #tpu.dot_dimension_numbers<[2], [2], [1], [1], [0, 0, 0, 1, 1, 1], [0], [0]>} : vector<2x8x8xbf16>, vector<2x8x8xbf16>, vector<2x8x8xf32> -> vector<2x8x8xf32>
    "tpu.trace_stop"() : () -> ()
    %68 = vector.broadcast %34 : vector<2x1x8xf32> to vector<2x8x8xf32>
    %69 = arith.addf %67, %68 : vector<2x8x8xf32>
    %cst_35 = arith.constant dense<0xFF800000> : vector<2x8xf32>
    %70 = vector.multi_reduction <maximumf>, %69, %cst_35 [2] : vector<2x8x8xf32> to vector<2x8xf32>
    %71 = vector.shape_cast %70 : vector<2x8xf32> to vector<2x8x1xf32>
    %72 = vector.broadcast %71 : vector<2x8x1xf32> to vector<2x8x8xf32>
    %73 = arith.subf %69, %72 : vector<2x8x8xf32>
    %74 = math.exp %73 : vector<2x8x8xf32>
    %cst_36 = arith.constant dense<0.000000e+00> : vector<2x8xf32>
    %75 = vector.multi_reduction <add>, %74, %cst_36 [2] : vector<2x8x8xf32> to vector<2x8xf32>
    %76 = vector.shape_cast %75 : vector<2x8xf32> to vector<2x8x1xf32>
    %77 = tpu.reciprocal %76 {approx = true} : vector<2x8x1xf32> -> vector<2x8x1xf32>
    %78 = vector.broadcast %77 : vector<2x8x1xf32> to vector<2x8x8xf32>
    %79 = arith.mulf %74, %78 : vector<2x8x8xf32>
    %80 = arith.truncf %79 : vector<2x8x8xf32> to vector<2x8x8xbf16>
    "tpu.trace_start"() <{level = 10 : i32, message = "bqk,bkd->bqd"}> : () -> ()
    %cst_37 = arith.constant dense<0.000000e+00> : vector<2x8x8xf32>
    %81 = tpu.matmul %80, %66, %cst_37 {dimension_numbers = #tpu.dot_dimension_numbers<[2], [1], [1], [2], [0, 0, 0, 1, 1, 2], [0], [0]>} : vector<2x8x8xbf16>, vector<2x8x8xbf16>, vector<2x8x8xf32> -> vector<2x8x8xf32>
    "tpu.trace_stop"() : () -> ()
    %82 = vector.shape_cast %81 : vector<2x8x8xf32> to vector<16x8xf32>
    %83 = arith.truncf %82 : vector<16x8xf32> to vector<16x8xbf16>
    %c0_38 = arith.constant 0 : index
    %c8 = arith.constant 8 : index
    %c0_39 = arith.constant 0 : index
    %84 = vector.load %arg5[%c0_38, %c8, %c0_39] : memref<1x32x32xbf16, #tpu.memory_space<vmem>>, vector<1x8x32xbf16>
    %85 = vector.shape_cast %84 : vector<1x8x32xbf16> to vector<8x32xbf16>
    %cst_40 = arith.constant dense<0.000000e+00> : vector<16x32xf32>
    %86 = tpu.matmul %83, %85, %cst_40 {dimension_numbers = #tpu.dot_dimension_numbers<[1], [0], [0], [1], [0, 0, 1, 1], [], []>} : vector<16x8xbf16>, vector<8x32xbf16>, vector<16x32xf32> -> vector<16x32xf32>
    %87 = arith.addf %60, %86 : vector<16x32xf32>
    %88 = vector.extract_strided_slice %29 {offsets = [0, 16], sizes = [16, 8], strides = [1, 1]} : vector<16x32xbf16> to vector<16x8xbf16>
    %89 = vector.shape_cast %88 : vector<16x8xbf16> to vector<2x8x8xbf16>
    %90 = vector.extract_strided_slice %31 {offsets = [0, 16], sizes = [16, 8], strides = [1, 1]} : vector<16x32xbf16> to vector<16x8xbf16>
    %91 = vector.shape_cast %90 : vector<16x8xbf16> to vector<2x8x8xbf16>
    %92 = vector.extract_strided_slice %33 {offsets = [0, 16], sizes = [16, 8], strides = [1, 1]} : vector<16x32xbf16> to vector<16x8xbf16>
    %93 = vector.shape_cast %92 : vector<16x8xbf16> to vector<2x8x8xbf16>
    "tpu.trace_start"() <{level = 10 : i32, message = "bqd,bkd->bqk"}> : () -> ()
    %cst_41 = arith.constant dense<0.000000e+00> : vector<2x8x8xf32>
    %94 = tpu.matmul %89, %91, %cst_41 {dimension_numbers = #tpu.dot_dimension_numbers<[2], [2], [1], [1], [0, 0, 0, 1, 1, 1], [0], [0]>} : vector<2x8x8xbf16>, vector<2x8x8xbf16>, vector<2x8x8xf32> -> vector<2x8x8xf32>
    "tpu.trace_stop"() : () -> ()
    %95 = vector.broadcast %34 : vector<2x1x8xf32> to vector<2x8x8xf32>
    %96 = arith.addf %94, %95 : vector<2x8x8xf32>
    %cst_42 = arith.constant dense<0xFF800000> : vector<2x8xf32>
    %97 = vector.multi_reduction <maximumf>, %96, %cst_42 [2] : vector<2x8x8xf32> to vector<2x8xf32>
    %98 = vector.shape_cast %97 : vector<2x8xf32> to vector<2x8x1xf32>
    %99 = vector.broadcast %98 : vector<2x8x1xf32> to vector<2x8x8xf32>
    %100 = arith.subf %96, %99 : vector<2x8x8xf32>
    %101 = math.exp %100 : vector<2x8x8xf32>
    %cst_43 = arith.constant dense<0.000000e+00> : vector<2x8xf32>
    %102 = vector.multi_reduction <add>, %101, %cst_43 [2] : vector<2x8x8xf32> to vector<2x8xf32>
    %103 = vector.shape_cast %102 : vector<2x8xf32> to vector<2x8x1xf32>
    %104 = tpu.reciprocal %103 {approx = true} : vector<2x8x1xf32> -> vector<2x8x1xf32>
    %105 = vector.broadcast %104 : vector<2x8x1xf32> to vector<2x8x8xf32>
    %106 = arith.mulf %101, %105 : vector<2x8x8xf32>
    %107 = arith.truncf %106 : vector<2x8x8xf32> to vector<2x8x8xbf16>
    "tpu.trace_start"() <{level = 10 : i32, message = "bqk,bkd->bqd"}> : () -> ()
    %cst_44 = arith.constant dense<0.000000e+00> : vector<2x8x8xf32>
    %108 = tpu.matmul %107, %93, %cst_44 {dimension_numbers = #tpu.dot_dimension_numbers<[2], [1], [1], [2], [0, 0, 0, 1, 1, 2], [0], [0]>} : vector<2x8x8xbf16>, vector<2x8x8xbf16>, vector<2x8x8xf32> -> vector<2x8x8xf32>
    "tpu.trace_stop"() : () -> ()
    %109 = vector.shape_cast %108 : vector<2x8x8xf32> to vector<16x8xf32>
    %110 = arith.truncf %109 : vector<16x8xf32> to vector<16x8xbf16>
    %c0_45 = arith.constant 0 : index
    %c16 = arith.constant 16 : index
    %c0_46 = arith.constant 0 : index
    %111 = vector.load %arg5[%c0_45, %c16, %c0_46] : memref<1x32x32xbf16, #tpu.memory_space<vmem>>, vector<1x8x32xbf16>
    %112 = vector.shape_cast %111 : vector<1x8x32xbf16> to vector<8x32xbf16>
    %cst_47 = arith.constant dense<0.000000e+00> : vector<16x32xf32>
    %113 = tpu.matmul %110, %112, %cst_47 {dimension_numbers = #tpu.dot_dimension_numbers<[1], [0], [0], [1], [0, 0, 1, 1], [], []>} : vector<16x8xbf16>, vector<8x32xbf16>, vector<16x32xf32> -> vector<16x32xf32>
    %114 = arith.addf %87, %113 : vector<16x32xf32>
    %115 = vector.extract_strided_slice %29 {offsets = [0, 24], sizes = [16, 8], strides = [1, 1]} : vector<16x32xbf16> to vector<16x8xbf16>
    %116 = vector.shape_cast %115 : vector<16x8xbf16> to vector<2x8x8xbf16>
    %117 = vector.extract_strided_slice %31 {offsets = [0, 24], sizes = [16, 8], strides = [1, 1]} : vector<16x32xbf16> to vector<16x8xbf16>
    %118 = vector.shape_cast %117 : vector<16x8xbf16> to vector<2x8x8xbf16>
    %119 = vector.extract_strided_slice %33 {offsets = [0, 24], sizes = [16, 8], strides = [1, 1]} : vector<16x32xbf16> to vector<16x8xbf16>
    %120 = vector.shape_cast %119 : vector<16x8xbf16> to vector<2x8x8xbf16>
    "tpu.trace_start"() <{level = 10 : i32, message = "bqd,bkd->bqk"}> : () -> ()
    %cst_48 = arith.constant dense<0.000000e+00> : vector<2x8x8xf32>
    %121 = tpu.matmul %116, %118, %cst_48 {dimension_numbers = #tpu.dot_dimension_numbers<[2], [2], [1], [1], [0, 0, 0, 1, 1, 1], [0], [0]>} : vector<2x8x8xbf16>, vector<2x8x8xbf16>, vector<2x8x8xf32> -> vector<2x8x8xf32>
    "tpu.trace_stop"() : () -> ()
    %122 = vector.broadcast %34 : vector<2x1x8xf32> to vector<2x8x8xf32>
    %123 = arith.addf %121, %122 : vector<2x8x8xf32>
    %cst_49 = arith.constant dense<0xFF800000> : vector<2x8xf32>
    %124 = vector.multi_reduction <maximumf>, %123, %cst_49 [2] : vector<2x8x8xf32> to vector<2x8xf32>
    %125 = vector.shape_cast %124 : vector<2x8xf32> to vector<2x8x1xf32>
    %126 = vector.broadcast %125 : vector<2x8x1xf32> to vector<2x8x8xf32>
    %127 = arith.subf %123, %126 : vector<2x8x8xf32>
    %128 = math.exp %127 : vector<2x8x8xf32>
    %cst_50 = arith.constant dense<0.000000e+00> : vector<2x8xf32>
    %129 = vector.multi_reduction <add>, %128, %cst_50 [2] : vector<2x8x8xf32> to vector<2x8xf32>
    %130 = vector.shape_cast %129 : vector<2x8xf32> to vector<2x8x1xf32>
    %131 = tpu.reciprocal %130 {approx = true} : vector<2x8x1xf32> -> vector<2x8x1xf32>
    %132 = vector.broadcast %131 : vector<2x8x1xf32> to vector<2x8x8xf32>
    %133 = arith.mulf %128, %132 : vector<2x8x8xf32>
    %134 = arith.truncf %133 : vector<2x8x8xf32> to vector<2x8x8xbf16>
    "tpu.trace_start"() <{level = 10 : i32, message = "bqk,bkd->bqd"}> : () -> ()
    %cst_51 = arith.constant dense<0.000000e+00> : vector<2x8x8xf32>
    %135 = tpu.matmul %134, %120, %cst_51 {dimension_numbers = #tpu.dot_dimension_numbers<[2], [1], [1], [2], [0, 0, 0, 1, 1, 2], [0], [0]>} : vector<2x8x8xbf16>, vector<2x8x8xbf16>, vector<2x8x8xf32> -> vector<2x8x8xf32>
    "tpu.trace_stop"() : () -> ()
    %136 = vector.shape_cast %135 : vector<2x8x8xf32> to vector<16x8xf32>
    %137 = arith.truncf %136 : vector<16x8xf32> to vector<16x8xbf16>
    %c0_52 = arith.constant 0 : index
    %c24 = arith.constant 24 : index
    %c0_53 = arith.constant 0 : index
    %138 = vector.load %arg5[%c0_52, %c24, %c0_53] : memref<1x32x32xbf16, #tpu.memory_space<vmem>>, vector<1x8x32xbf16>
    %139 = vector.shape_cast %138 : vector<1x8x32xbf16> to vector<8x32xbf16>
    %cst_54 = arith.constant dense<0.000000e+00> : vector<16x32xf32>
    %140 = tpu.matmul %137, %139, %cst_54 {dimension_numbers = #tpu.dot_dimension_numbers<[1], [0], [0], [1], [0, 0, 1, 1], [], []>} : vector<16x8xbf16>, vector<8x32xbf16>, vector<16x32xf32> -> vector<16x32xf32>
    %141 = arith.addf %114, %140 : vector<16x32xf32>
    %142 = vector.broadcast %7 : vector<1x32xf32> to vector<16x32xf32>
    %143 = arith.addf %141, %142 : vector<16x32xf32>
    %144 = arith.addf %3, %143 : vector<16x32xf32>
    %cst_55 = arith.constant dense<0.000000e+00> : vector<16xf32>
    %145 = vector.multi_reduction <add>, %144, %cst_55 [1] : vector<16x32xf32> to vector<16xf32>
    %146 = vector.shape_cast %145 : vector<16xf32> to vector<16x1xf32>
    %cst_56 = arith.constant 3.200000e+01 : f32
    %147 = vector.broadcast %cst_56 : f32 to vector<16x1xf32>
    %148 = arith.divf %146, %147 : vector<16x1xf32>
    %149 = vector.broadcast %148 : vector<16x1xf32> to vector<16x32xf32>
    %150 = arith.subf %144, %149 : vector<16x32xf32>
    %151 = arith.mulf %150, %150 : vector<16x32xf32>
    %cst_57 = arith.constant dense<0.000000e+00> : vector<16xf32>
    %152 = vector.multi_reduction <add>, %151, %cst_57 [1] : vector<16x32xf32> to vector<16xf32>
    %153 = vector.shape_cast %152 : vector<16xf32> to vector<16x1xf32>
    %cst_58 = arith.constant 3.200000e+01 : f32
    %154 = vector.broadcast %cst_58 : f32 to vector<16x1xf32>
    %155 = arith.divf %153, %154 : vector<16x1xf32>
    %156 = vector.broadcast %148 : vector<16x1xf32> to vector<16x32xf32>
    %157 = arith.subf %144, %156 : vector<16x32xf32>
    %cst_59 = arith.constant 9.99999974E-6 : f32
    %158 = vector.broadcast %cst_59 : f32 to vector<16x1xf32>
    %159 = arith.addf %155, %158 : vector<16x1xf32>
    %160 = math.rsqrt %159 : vector<16x1xf32>
    %161 = vector.broadcast %160 : vector<16x1xf32> to vector<16x32xf32>
    %162 = arith.mulf %157, %161 : vector<16x32xf32>
    %163 = vector.broadcast %9 : vector<1x32xf32> to vector<16x32xf32>
    %164 = arith.mulf %162, %163 : vector<16x32xf32>
    %165 = vector.broadcast %11 : vector<1x32xf32> to vector<16x32xf32>
    %166 = arith.addf %164, %165 : vector<16x32xf32>
    %167 = arith.truncf %166 : vector<16x32xf32> to vector<16x32xbf16>
    %c0_60 = arith.constant 0 : index
    %c0_61 = arith.constant 0 : index
    %c0_62 = arith.constant 0 : index
    %168 = vector.load %arg6[%c0_60, %c0_61, %c0_62] : memref<1x32x64xbf16, #tpu.memory_space<vmem>>, vector<1x32x64xbf16>
    %169 = vector.shape_cast %168 : vector<1x32x64xbf16> to vector<32x64xbf16>
    %cst_63 = arith.constant dense<0.000000e+00> : vector<16x64xf32>
    %170 = tpu.matmul %167, %169, %cst_63 {dimension_numbers = #tpu.dot_dimension_numbers<[1], [0], [0], [1], [0, 0, 1, 1], [], []>} : vector<16x32xbf16>, vector<32x64xbf16>, vector<16x64xf32> -> vector<16x64xf32>
    %171 = vector.broadcast %13 : vector<1x64xf32> to vector<16x64xf32>
    %172 = arith.addf %170, %171 : vector<16x64xf32>
    %cst_64 = arith.constant 0.000000e+00 : f32
    %173 = vector.broadcast %cst_64 : f32 to vector<16x64xf32>
    %174 = arith.maximumf %172, %173 : vector<16x64xf32>
    %175 = arith.truncf %174 : vector<16x64xf32> to vector<16x64xbf16>
    %c0_65 = arith.constant 0 : index
    %c0_66 = arith.constant 0 : index
    %c0_67 = arith.constant 0 : index
    %176 = vector.load %arg7[%c0_65, %c0_66, %c0_67] : memref<1x64x32xbf16, #tpu.memory_space<vmem>>, vector<1x64x32xbf16>
    %177 = vector.shape_cast %176 : vector<1x64x32xbf16> to vector<64x32xbf16>
    %cst_68 = arith.constant dense<0.000000e+00> : vector<16x32xf32>
    %178 = tpu.matmul %175, %177, %cst_68 {dimension_numbers = #tpu.dot_dimension_numbers<[1], [0], [0], [1], [0, 0, 1, 1], [], []>} : vector<16x64xbf16>, vector<64x32xbf16>, vector<16x32xf32> -> vector<16x32xf32>
    %179 = vector.broadcast %15 : vector<1x32xf32> to vector<16x32xf32>
    %180 = arith.addf %178, %179 : vector<16x32xf32>
    %181 = arith.addf %166, %180 : vector<16x32xf32>
    %cst_69 = arith.constant dense<0.000000e+00> : vector<16xf32>
    %182 = vector.multi_reduction <add>, %181, %cst_69 [1] : vector<16x32xf32> to vector<16xf32>
    %183 = vector.shape_cast %182 : vector<16xf32> to vector<16x1xf32>
    %cst_70 = arith.constant 3.200000e+01 : f32
    %184 = vector.broadcast %cst_70 : f32 to vector<16x1xf32>
    %185 = arith.divf %183, %184 : vector<16x1xf32>
    %186 = vector.broadcast %185 : vector<16x1xf32> to vector<16x32xf32>
    %187 = arith.subf %181, %186 : vector<16x32xf32>
    %188 = arith.mulf %187, %187 : vector<16x32xf32>
    %cst_71 = arith.constant dense<0.000000e+00> : vector<16xf32>
    %189 = vector.multi_reduction <add>, %188, %cst_71 [1] : vector<16x32xf32> to vector<16xf32>
    %190 = vector.shape_cast %189 : vector<16xf32> to vector<16x1xf32>
    %cst_72 = arith.constant 3.200000e+01 : f32
    %191 = vector.broadcast %cst_72 : f32 to vector<16x1xf32>
    %192 = arith.divf %190, %191 : vector<16x1xf32>
    %193 = vector.broadcast %185 : vector<16x1xf32> to vector<16x32xf32>
    %194 = arith.subf %181, %193 : vector<16x32xf32>
    %cst_73 = arith.constant 9.99999974E-6 : f32
    %195 = vector.broadcast %cst_73 : f32 to vector<16x1xf32>
    %196 = arith.addf %192, %195 : vector<16x1xf32>
    %197 = math.rsqrt %196 : vector<16x1xf32>
    %198 = vector.broadcast %197 : vector<16x1xf32> to vector<16x32xf32>
    %199 = arith.mulf %194, %198 : vector<16x32xf32>
    %200 = vector.broadcast %17 : vector<1x32xf32> to vector<16x32xf32>
    %201 = arith.mulf %199, %200 : vector<16x32xf32>
    %202 = vector.broadcast %19 : vector<1x32xf32> to vector<16x32xf32>
    %203 = arith.addf %201, %202 : vector<16x32xf32>
    %c0_74 = arith.constant 0 : index
    %c0_75 = arith.constant 0 : index
    %204 = vector.load %arg9[%c0_74, %c0_75] : memref<16x32xf32, #tpu.memory_space<vmem>>, vector<16x32xf32>
    tpu.vector_store %arg9[%c0_74, %c0_75], %203 {strides = array<i32>} : memref<16x32xf32, #tpu.memory_space<vmem>>, vector<16x32xf32>,
    return
  }
  func.func @transform_0(%arg0: i32, %arg1: i32) -> (i32, i32) {
    %c0_i32 = arith.constant 0 : i32
    %c0_i32_0 = arith.constant 0 : i32
    return %arg0, %c0_i32 : i32, i32
  }
  func.func @transform_1(%arg0: i32, %arg1: i32) -> (i32, i32, i32) {
    %c0_i32 = arith.constant 0 : i32
    %c0_i32_0 = arith.constant 0 : i32
    %c0_i32_1 = arith.constant 0 : i32
    return %arg0, %c0_i32, %c0_i32_0 : i32, i32, i32
  }
  func.func @transform_2(%arg0: i32, %arg1: i32) -> (i32, i32, i32) {
    %c0_i32 = arith.constant 0 : i32
    %c0_i32_0 = arith.constant 0 : i32
    %c0_i32_1 = arith.constant 0 : i32
    return %arg1, %c0_i32, %c0_i32_0 : i32, i32, i32
  }
  func.func @transform_3(%arg0: i32, %arg1: i32) -> (i32, i32, i32) {
    %c0_i32 = arith.constant 0 : i32
    %c0_i32_0 = arith.constant 0 : i32
    %c0_i32_1 = arith.constant 0 : i32
    return %arg1, %c0_i32, %c0_i32_0 : i32, i32, i32
  }
  func.func @transform_4(%arg0: i32, %arg1: i32) -> (i32, i32, i32) {
    %c0_i32 = arith.constant 0 : i32
    %c0_i32_0 = arith.constant 0 : i32
    %c0_i32_1 = arith.constant 0 : i32
    return %arg1, %c0_i32, %c0_i32_0 : i32, i32, i32
  }
  func.func @transform_5(%arg0: i32, %arg1: i32) -> (i32, i32, i32) {
    %c0_i32 = arith.constant 0 : i32
    %c0_i32_0 = arith.constant 0 : i32
    %c0_i32_1 = arith.constant 0 : i32
    return %arg1, %c0_i32, %c0_i32_0 : i32, i32, i32
  }
  func.func @transform_6(%arg0: i32, %arg1: i32) -> (i32, i32, i32) {
    %c0_i32 = arith.constant 0 : i32
    %c0_i32_0 = arith.constant 0 : i32
    %c0_i32_1 = arith.constant 0 : i32
    return %arg1, %c0_i32, %c0_i32_0 : i32, i32, i32
  }
  func.func @transform_7(%arg0: i32, %arg1: i32) -> (i32, i32) {
    %c0_i32 = arith.constant 0 : i32
    %c0_i32_0 = arith.constant 0 : i32
    return %arg0, %c0_i32 : i32, i32
  }
}

</mosaic_0001>

<bundles_post_ra>
// kernel: _text_encoder_forward.1
= control target key start
LH: loop header
LB: loop body
LE: loop exit
PB: predicated region body
PF: predicated region fallthrough
CT: control target
= control target key end

     0   :  { %12 = vsyncpa [#allocation3], 0  ;;  %s2114_s0 = inlined_call_operand.hbm [shape: f32[16,32], index: 0, kind: input, shape index: {}]   ;;  %s2115_s1 = inlined_call_operand.vmem [shape: f32[2,1,8], index: 1, kind: input, shape index: {}]   ;;  %s2116_s2 = inlined_call_operand.vmem [shape: bf16[2,32,96], index: 2, kind: input, shape index: {}]   ;;  %s2117_s3 = inlined_call_operand.vmem [shape: bf16[2,32,32], index: 3, kind: input, shape index: {}]   ;;  %s2118_s4 = inlined_call_operand.vmem [shape: bf16[2,32,64], index: 4, kind: input, shape index: {}]   ;;  %s2119_s5 = inlined_call_operand.vmem [shape: bf16[2,64,32], index: 5, kind: input, shape index: {}]   ;;  %s2120_s6 = inlined_call_operand.hbm [shape: f32[2,8,96], index: 6, kind: input, shape index: {}]   ;;  %s2121_s7 = inlined_call_operand.vmem [shape: f32[16,32], index: 7, kind: output, shape index: {}]  }
   0x1   :  { %13 = vsyncpa [#allocation5], 0 }
   0x2   :  { %15 = vsyncpa [#allocation5 + $0x1], 0  ;;  %s1801_s24 = smov 0   ;;  %s1803_s25 = smov 0  }
   0x3   :  { %s1805_s26 = smov 0   ;;  %s1807_s27 = smov 0  }
   0x4   :  { %s1809_s28 = smov 0   ;;  %s1811_s29 = smov 0  }
   0x5 LB: > { %s1408_s30 = sadd.s32 4294967295, %s1744_s29   ;;  %p1409_p0 = scmp.ge.s32.totalorder %s1744_s29, 1  ;;  %s1744_s29 = sphi %s1811_s29, %s21_s29   ;;  %s1740_s28 = sphi %s1809_s28, %s2130_s28   ;;  %s1736_s27 = sphi %s1807_s27, %s2129_s27   ;;  %s1732_s26 = sphi %s1805_s26, %s2128_s26   ;;  %s1728_s25 = sphi %s1803_s25, %s2127_s25   ;;  %s1724_s24 = sphi %s1801_s24, %s2126_s24  }
   0x6   : > { %p1833_p1 = scmp.eq.s32.totalorder %s1408_s30, 0  ;;  %p246_p2 = scmp.lt.s32.totalorder %s1744_s29, 3 }
   0x7   : > { %s260_s11 = sshll.u32 %s2114_s0, 4  ;;  %s1746_s13 = smov [#allocation2]   ;;  %s261_s11 = int_to_ptr.hbm [resolvable:$true] %s260_s11 }
   0x8   : > { %p1841_p3 = pnand %p1409_p0, %p246_p2  ;;  %s262_s14 = sshll.u32 %s1746_s13, 4  ;;  %s263_s14 = int_to_ptr.vmem [resolvable:$true] %s262_s14 }
   0x9   : > { %s1747_s15 = smov 128   ;;  %s1748_s16 = smov 8  }
   0xa   : > { %p1504_p4 = pneg %p1841_p3  ;;  %s30_s17 = sadd.s32 1, %s1740_s28 }
   0xb   : > { %p31_p6 = scmp.ge.s32.totalorder %s30_s17, 2  ;;  %p203_p7 = scmp.ne.s32.totalorder %s1732_s26, %s1728_s25 }
   0xc   : > { %p1505_p5 = pnand %p1504_p4, %p1833_p1  ;;  %p204_p8 = scmp.eq.s32.totalorder %s1744_s29, 0 }
   0xd   : > { %s2132_s17 = smov (%p31_p6, %s30_s17), 0  ;;  %s196_s18 = sadd.s32 1, %s1732_s26 }
   0xe   : > { %1507 = dma.hbm_to_vmem [thread:$0]  (!%p1505_p5), %s261_s11, 256, %s263_s14, [#allocation3], %s1747_s15, %s1747_s15, %s1748_s16  }
   0xf   : > { %p209_p9 = scmp.ne.s32.totalorder %s1728_s25, %s1724_s24  ;;  %s193_s19 = ssub.s32 %s1740_s28, %s2132_s17 }
  0x10   : > { %p1860_p10 = por %p204_p8, %p203_p7  ;;  %p194_p11 = scmp.eq.s32.totalorder %s193_s19, 0 }
  0x11   : > { %p1866_p12 = por %p1833_p1, %p209_p9  ;;  %s316_s22 = sand.u32 1, %s1732_s26  }
  0x12   : > { %s1414_s23 = sshll.u32 %s1740_s28, 3  ;;  %p1513_p13 = scmp.lt.s32.totalorder %s1744_s29, 2 }
  0x13   : > { %s1873_s30 = scalar_select %p194_p11, %s1732_s26, %s196_s18  }
  0x14   : > { %s1413_s9 = sshll.u32 %s316_s22, 3  ;;  %s324_s11 = scalar_lea.hbm %s2120_s6, %s1414_s23 }
  0x15   : > { %s326_s13 = sshll.u32 %s324_s11, 4  ;;  %s320_s14 = scalar_lea.vmem [#allocation4], %s1413_s9  ;;  %s327_s13 = int_to_ptr.hbm [resolvable:$true] %s326_s13 }
  0x16   : > { %s328_s15 = sshll.u32 %s320_s14, 4  ;;  %p1509_p0 = pnand %p1513_p13, %p1860_p10  ;;  %s329_s15 = int_to_ptr.vmem [resolvable:$true] %s328_s15 }
  0x17   : > { %s317_s16 = scalar_lea.sflag [#allocation5], %s316_s22  ;;  %337 = sbr.rel (%p1841_p3) target bundleno = 2598 (0xa26), region = 48 }
  0x18   : > { %1511 = dma.hbm_to_vmem [thread:$0]  (!%p1509_p0), %s327_s13, 128, %s329_s15, %s317_s16  }
  0x1c   : > { %1715 = dma.done.wait (%p1833_p1), [#allocation3], 256  }
  0x1d   : > { %1717 = vsyncadd (%p1833_p1), [#allocation3], 4294967040  ;;  %s344_s18 = sand.u32 1, %s1728_s25  }
  0x1e   : > { %s1417_s19 = sshll.u32 %s344_s18, 3  ;;  %s345_s23 = scalar_lea.sflag [#allocation5], %s344_s18 }
  0x1f   : > { %s1888_s9 = scalar_lea.vmem [#allocation4], %s1417_s19 }
  0x20   : > { %1719 = dma.done.wait (%p1866_p12), %s345_s23, 128  }
  0x21   : > { %1721 = vsyncadd (%p1866_p12), %s345_s23, 4294967168  ;;  %p410_p2 = scmp.lt.s32.totalorder %s1736_s27, 1  ;;  %p1426_p1 = scmp.ne.s32.totalorder %s1736_s27, 0 }
  0x23   : > { %s411_s12 = scalar_select %p410_p2, %s1736_s27, 1 }
  0x24   : > { %440 = sbr.rel (%p1426_p1) target bundleno = 44 (0x2c), region = 60 }
  0x25   : > { %s1486_s20 = sshll.u32 %s411_s12, 4  ;;  %s1489_s22 = sshll.u32 %s411_s12, 5 }
  0x26   : > { %s414_s24 = scalar_lea.vmem %s2116_s2, %s1486_s20  ;;  %s1902_s14 = scalar_lea.vmem %s2117_s3, %s1486_s20 }
  0x27   : > { %s1907_s21 = scalar_lea.vmem %s2118_s4, %s1486_s20  ;;  %s1912_s23 = scalar_lea.vmem %s2119_s5, %s1489_s22 }
  0x29   : > { %v441_v0 = vld [vmem:[#allocation2] sm:$0xff]  ;;  %vm443_vm0 = vcmask 261120   ;;  %v442_v1 = vld [vmem:[#allocation2 + $0x8] sm:$0xff] }
  0x2a   : > { %444 = vst.msk [vmem:[%s2121_s7] sm:$0xff] %vm443_vm0, %v441_v0 }
  0x2b   : > { %445 = vst.msk [vmem:[%s2121_s7 + $0x8] sm:$0xff] %vm443_vm0, %v442_v1 }
  0x2c PF: > { %v1491_v2 = vld [vmem:[%s414_s24 + $0x8] sm:$0xff]  ;;  %v1490_v3 = vld [vmem:[%s414_s24] sm:$0xff]  ;;  %vm474_vm1 = vcmask 261120   ;;  %v1578_v7 = vld [vmem:[%s1888_s9] ss:$0 sm:$0xff]  ;;  %s1749_s24 = smov 96  }
  0x2d   : > { %484 = vmatpush.bf16.msra.mxu0 %v1491_v2  ;;  %s1750_s15 = smov 88   ;;  %s1751_s16 = smov 120   ;;  %vm511_vm2 = vcmask 64512   ;;  %vm584_vm3 = vcmask 1043456   ;;  %v1963_v38 = vld [vmem:[%s2115_s1] ss:$0 sm:$0xff] }
  0x2e   : > { %s1752_s18 = smov 56   ;;  %v1972_v47 = vld [vmem:[%s2115_s1 + $0x1] ss:$0 sm:$0xff]  ;;  %s1753_s11 = smov 80   ;;  %vm1189_vm11 = vcmask 523264  }
  0x2f   : > { %s1754_s20 = smov 64   ;;  %s1755_s22 = smov 112  }
  0x30   : > { %s1756_s27 = smov 48   ;;  %s1757_s13 = smov 72  }
  0x31   : > { %v1924_v4 = vld [vmem:[%s2121_s7] sm:$0xff]  ;;  %485 = vmatpush.bf16.msra.mxu0 %v1490_v3 }
  0x32   : > { %v1929_v5 = vld [vmem:[%s2121_s7 + $0x8] sm:$0xff] }
  0x33   : > { %v456_v6 = vpack.c.bf16 %v1929_v5, %v1924_v4 }
  0x35   : > { %1435 = vmatmul.msk.bf16.vlgmr.msra.gmra.mxu0 %vm474_vm1, %v456_v6 }
  0xb2   : > { %v487_v8 = vpop.f32.mrf.mxu0 }
  0xb3   : > { %v488_v9 = vadd.f32 %v1578_v7, %v487_v8 }
  0xb5   : > { %v496_v10 = vpack.c.bf16 %v488_v9, %v488_v9  ;;  %v492_v11 = vmul.f32 0.35355338, %v488_v9 }
  0xb7   : > { %v507_v12 = vunpack.c.l.b16 %v496_v10  ;;  %v494_v14 = vpack.c.bf16 %v492_v11, %v492_v11 }
  0xb9   : > { %v1935_v13 = vpack.c.b16 %v507_v12, %v507_v12  ;;  %v625_v19 = vunpack.c.l.b16 %v494_v14 }
  0xba   : > { %v489_v15 = vpop.f32.mrf.mxu0 }
  0xbb   : > { %v490_v16 = vadd.f32 %v1578_v7, %v489_v15  ;;  %509 = vrot.lane.b32.xlu1 %v1935_v13, %s1749_s24  ;;  %629 = vrot.lane.b32.xlu0 %v1935_v13, %s1750_s15  ;;  %v1941_v23 = vpack.c.b16 %v625_v19, %v625_v19 }
  0xbd   : > { %v493_v17 = vmul.f32 0.35355338, %v490_v16  ;;  %v497_v18 = vpack.c.bf16 %v490_v16, %v490_v16 }
  0xbf   : > { %v532_v20 = vunpack.c.l.b16 %v497_v18  ;;  %v495_v21 = vpack.c.bf16 %v493_v17, %v493_v17 }
  0xc1   : > { %v1939_v22 = vpack.c.b16 %v532_v20, %v532_v20  ;;  %v651_v24 = vunpack.c.l.b16 %v495_v21 }
  0xc3   : > { %655 = vrot.lane.b32.xlu2 %v1939_v22, %s1750_s15  ;;  %534 = vrot.lane.b32.xlu1 %v1939_v22, %s1749_s24  ;;  %v1946_v25 = vpack.c.b16 %v651_v24, %v651_v24  ;;  %s1758_s24 = smov 104   ;;  %s1759_s15 = smov 40  }
  0xc4   : > { %627 = vrot.lane.b32.xlu0 %v1941_v23, %s1751_s16 }
  0xcb   : > { %653 = vrot.lane.b32.xlu2 %v1946_v25, %s1751_s16 }
  0xd3   : > { %700 = vrot.lane.b32.xlu2 %v1935_v13, %s1752_s18 }
 0x11d   : > { %v656_v26 = vpop.permute.xlu2 %655 }
 0x11e   : > { %v661_v32 = vsel %vm511_vm2, %v656_v26, 0 }
 0x125   : > { %v654_v27 = vpop.permute.xlu2 %653 }
 0x12d   : > { %v510_v28 = vpop.permute.xlu1 %509  ;;  %v630_v29 = vpop.permute.xlu0 %629 }
 0x12e   : > { %v516_v30 = vsel %vm511_vm2, %v510_v28, 0  ;;  %v635_v31 = vsel %vm511_vm2, %v630_v29, 0  ;;  %v701_v33 = vpop.permute.xlu2 %700 }
 0x12f   : > { %525 = vmatpush.bf16.xpose.msra.mxu1 %v516_v30  ;;  %644 = vmatpush.bf16.xpose.msrb.mxu0 %v635_v31  ;;  %v706_v37 = vsel %vm584_vm3, %v701_v33, 0 }
 0x135   : > { %v535_v34 = vpop.permute.xlu1 %534 }
 0x136   : > { %v628_v35 = vpop.permute.xlu0 %627  ;;  %1436 = vmatmul.msk.bf16.vlgmr.msra.gmra.mxu1 %vm511_vm2, %v494_v14  ;;  %v540_v36 = vsel %vm511_vm2, %v535_v34, 0 }
 0x137   : > { %670 = vmatpush.bf16.xpose.msrb.mxu1 %v661_v32  ;;  %1440 = vmatmul.msk.bf16.vlgmr.msrb.gmra.mxu0 %vm511_vm2, %v628_v35 }
 0x138   : > { %549 = vmatpush.bf16.xpose.msra.mxu2 %v540_v36 }
 0x13f   : > { %1437 = vmatmul.msk.bf16.vlgmr.msra.gmra.mxu2 %vm511_vm2, %v495_v21  ;;  %v743_v21 = vld [vmem:[%s1902_s14 + $0x4] sm:$0xf] }
 0x140   : > { %715 = vmatpush.bf16.msrb.mxu2 %v706_v37  ;;  %v748_v24 = vsel %vm584_vm3, %v743_v21, 0 }
 0x141   : > { %757 = vmatpush.bf16.msra.mxu0 %v748_v24 }
 0x146   : > { %1441 = vmatmul.msk.bf16.vlgmr.msrb.gmra.mxu1 %vm511_vm2, %v654_v27 }
 0x1b3   : > { %v527_v39 = vpop.f32.mrf.mxu1 }
 0x1b4   : > { %v528_v40 = vadd.f32 %v1963_v38, %v527_v39  ;;  %v646_v41 = vpop.f32.mrf.mxu0 }
 0x1b5   : > { %v647_v42 = vadd.f32 %v1963_v38, %v646_v41 }
 0x1b6   : > { %v555_v43 = vsel %vm511_vm2, %v528_v40, -inf }
 0x1b7   : > { %v676_v44 = vsel %vm511_vm2, %v647_v42, -inf  ;;  %556 = vmax.xlane.f32.xlu2 %v555_v43 }
 0x1b8   : > { %677 = vmax.xlane.f32.xlu0 %v676_v44 }
 0x1bb   : > { %v529_v45 = vpop.f32.mrf.mxu1 }
 0x1bc   : > { %v648_v46 = vpop.f32.mrf.mxu0 }
 0x1c2   : > { %v551_v48 = vpop.f32.mrf.mxu2 }
 0x1c3   : > { %v552_v49 = vadd.f32 %v1972_v47, %v551_v48  ;;  %v672_v50 = vpop.f32.mrf.mxu1 }
 0x1c4   : > { %v673_v52 = vadd.f32 %v1972_v47, %v672_v50 }
 0x1c5   : > { %v558_v51 = vsel %vm511_vm2, %v552_v49, -inf }
 0x1c6   : > { %559 = vmax.xlane.f32.xlu2 %v558_v51  ;;  %v679_v55 = vsel %vm511_vm2, %v673_v52, -inf }
 0x1ca   : > { %v553_v53 = vpop.f32.mrf.mxu2 }
 0x1cb   : > { %v674_v54 = vpop.f32.mrf.mxu1 }
 0x1cc   : > { %786 = vrot.lane.b32.xlu0 %v1935_v13, %s1753_s11 }
 0x1ce   : > { %680 = vmax.xlane.f32.xlu2 %v679_v55 }
 0x1e6   : > { %579 = vrot.lane.b32.xlu2 %v1935_v13, %s1754_s20 }
 0x1ee   : > { %601 = vrot.lane.b32.xlu2 %v1939_v22, %s1754_s20 }
 0x22a   : > { %v557_v56 = vpop.xlane.xlu2 %556 }
 0x22b   : > { %v678_v57 = vpop.xlane.xlu0 %677  ;;  %v561_v58 = vsub.f32 %v528_v40, %v557_v56 }
 0x22c   : > { %v682_v59 = vsub.f32 %v647_v42, %v678_v57 }
 0x22d   : > { %v563_v60 = vmul.f32 1.442695, %v561_v58 }
 0x22e   : > { %v684_v61 = vmul.f32 1.442695, %v682_v59 }
 0x22f   : > { %1588 = vpow2.f32 %v563_v60 }
 0x230   : > { %1590 = vpow2.f32 %v684_v61 }
 0x235   : > { %v1589_v62 = vpop.eup %1588 }
 0x236   : > { %v1591_v63 = vpop.eup %1590  ;;  %v567_v0 = vsel %vm511_vm2, %v1589_v62, 0.0 }
 0x237   : > { %v688_v1 = vsel %vm511_vm2, %v1591_v63, 0.0  ;;  %568 = vadd.xlane.f32.xlu0 %v567_v0 }
 0x238   : > { %689 = vadd.xlane.f32.xlu1 %v688_v1 }
 0x239   : > { %v560_v2 = vpop.xlane.xlu2 %559 }
 0x23a   : > { %v562_v17 = vsub.f32 %v552_v49, %v560_v2 }
 0x23c   : > { %v565_v18 = vmul.f32 1.442695, %v562_v17 }
 0x23e   : > { %v787_v3 = vpop.permute.xlu0 %786 }
 0x23f   : > { %v792_v6 = vsel %vm511_vm2, %v787_v3, 0 }
 0x240   : > { %801 = vmatpush.bf16.xpose.msra.mxu2 %v792_v6 }
 0x241   : > { %v681_v7 = vpop.xlane.xlu2 %680 }
 0x242   : > { %v683_v8 = vsub.f32 %v673_v52, %v681_v7 }
 0x244   : > { %v686_v9 = vmul.f32 1.442695, %v683_v8 }
 0x246   : > { %1592 = vpow2.f32 %v686_v9 }
 0x247   : > { %1594 = vpow2.f32 %v565_v18 }
 0x249   : > { %v580_v10 = vpop.permute.xlu2 %579 }
 0x24a   : > { %v586_v11 = vsel %vm584_vm3, %v580_v10, 0 }
 0x24b   : > { %595 = vmatpush.bf16.msra.mxu3 %v586_v11  ;;  %721 = vrot.lane.b32.xlu0 %v1939_v22, %s1752_s18 }
 0x24c   : > { %v1593_v12 = vpop.eup %1592 }
 0x24d   : > { %v691_v14 = vsel %vm511_vm2, %v1593_v12, 0.0  ;;  %v1595_v19 = vpop.eup %1594 }
 0x24e   : > { %692 = vadd.xlane.f32.xlu2 %v691_v14  ;;  %v570_v20 = vsel %vm511_vm2, %v1595_v19, 0.0 }
 0x251   : > { %v602_v15 = vpop.permute.xlu2 %601  ;;  %784 = vrot.lane.b32.xlu1 %v1941_v23, %s1755_s22 }
 0x252   : > { %v607_v16 = vsel %vm584_vm3, %v602_v15, 0 }
 0x253   : > { %616 = vmatpush.bf16.msrb.mxu3 %v607_v16  ;;  %807 = vrot.lane.b32.xlu0 %v1946_v25, %s1755_s22 }
 0x266   : > { %854 = vrot.lane.b32.xlu2 %v1935_v13, %s1756_s27 }
 0x26e   : > { %922 = vrot.lane.b32.xlu2 %v1935_v13, %s1757_s13 }
 0x276   : > { %945 = vrot.lane.b32.xlu2 %v1939_v22, %s1757_s13 }
 0x27b   : > { %571 = vadd.xlane.f32.xlu1 %v570_v20 }
 0x294   : > { %809 = vrot.lane.b32.xlu1 %v1939_v22, %s1753_s11 }
 0x2aa   : > { %v569_v26 = vpop.xlane.xlu0 %568 }
 0x2ab   : > { %v690_v27 = vpop.xlane.xlu1 %689  ;;  %1596 = vrcp.f32 %v569_v26 }
 0x2ac   : > { %1598 = vrcp.f32 %v690_v27 }
 0x2b1   : > { %v1597_v28 = vpop.eup %1596 }
 0x2b2   : > { %v1599_v29 = vpop.eup %1598  ;;  %v575_v30 = vmul.f32 %v1597_v28, %v1589_v62  ;;  %v623_v62 = vld [vmem:[%s1902_s14] sm:$0xf] }
 0x2b3   : > { %v696_v31 = vmul.f32 %v1599_v29, %v1591_v63  ;;  %v768_v63 = vsel %vm584_vm3, %v623_v62, 0 }
 0x2b4   : > { %v577_v32 = vpack.c.bf16 %v575_v30, %v575_v30  ;;  %777 = vmatpush.bf16.msra.mxu1 %v768_v63 }
 0x2b5   : > { %v698_v33 = vpack.c.bf16 %v696_v31, %v696_v31 }
 0x2b6   : > { %1438 = vmatmul.msk.bf16.vlgmr.msra.gmra.mxu3 %vm511_vm2, %v577_v32 }
 0x2b7   : > { %1442 = vmatmul.msk.bf16.vlgmr.msrb.gmra.mxu2 %vm511_vm2, %v698_v33 }
 0x2bd   : > { %v722_v34 = vpop.permute.xlu0 %721 }
 0x2be   : > { %v727_v35 = vsel %vm584_vm3, %v722_v34, 0 }
 0x2bf   : > { %736 = vmatpush.bf16.msra.mxu3 %v727_v35 }
 0x2c1   : > { %v693_v36 = vpop.xlane.xlu2 %692 }
 0x2c3   : > { %v785_v37 = vpop.permute.xlu1 %784 }
 0x2c5   : > { %v808_v53 = vpop.permute.xlu0 %807 }
 0x2c7   : > { %1446 = vmatmul.msk.bf16.vlgmr.msra.gmra.mxu2 %vm511_vm2, %v785_v37 }
 0x2c9   : > { %v855_v39 = vpop.permute.xlu2 %854 }
 0x2ca   : > { %v860_v40 = vsel %vm584_vm3, %v855_v39, 0 }
 0x2cb   : > { %869 = vmatpush.bf16.msrb.mxu0 %v860_v40 }
 0x2d1   : > { %v923_v49 = vpop.permute.xlu2 %922 }
 0x2d2   : > { %v928_v52 = vsel %vm511_vm2, %v923_v49, 0 }
 0x2d9   : > { %v946_v3 = vpop.permute.xlu2 %945 }
 0x2da   : > { %v951_v8 = vsel %vm511_vm2, %v946_v3, 0 }
 0x2ee   : > { %v572_v41 = vpop.xlane.xlu1 %571 }
 0x2ef   : > { %1600 = vrcp.f32 %v572_v41  ;;  %v897_v41 = vld [vmem:[%s1902_s14 + $0x8] sm:$0xf] }
 0x2f0   : > { %1602 = vrcp.f32 %v693_v36 }
 0x2f5   : > { %v1601_v42 = vpop.eup %1600 }
 0x2f6   : > { %v576_v43 = vmul.f32 %v1601_v42, %v1595_v19  ;;  %v1603_v45 = vpop.eup %1602  ;;  %v902_v42 = vsel %vm584_vm3, %v897_v41, 0  ;;  %v1760_v41 = vmov 32.0  }
 0x2f7   : > { %v697_v46 = vmul.f32 %v1603_v45, %v1593_v12  ;;  %911 = vmatpush.bf16.msrb.mxu2 %v902_v42 }
 0x2f8   : > { %v578_v44 = vpack.c.bf16 %v576_v43, %v576_v43 }
 0x2f9   : > { %v699_v51 = vpack.c.bf16 %v697_v46, %v697_v46 }
 0x2fa   : > { %1439 = vmatmul.msk.bf16.vlgmr.msrb.gmra.mxu3 %vm511_vm2, %v578_v44 }
 0x306   : > { %v810_v48 = vpop.permute.xlu1 %809 }
 0x307   : > { %v815_v50 = vsel %vm511_vm2, %v810_v48, 0 }
 0x308   : > { %824 = vmatpush.bf16.xpose.msrb.mxu3 %v815_v50 }
 0x30a   : > { %1443 = vmatmul.msk.bf16.vlgmr.msra.gmra.mxu3 %vm511_vm2, %v699_v51 }
 0x310   : > { %937 = vmatpush.bf16.xpose.msra.mxu3 %v928_v52 }
 0x31a   : > { %1447 = vmatmul.msk.bf16.vlgmr.msrb.gmra.mxu3 %vm511_vm2, %v808_v53 }
 0x339   : > { %v597_v54 = vpop.f32.mrf.mxu3 }
 0x33a   : > { %v717_v55 = vpop.f32.mrf.mxu2 }
 0x341   : > { %v599_v56 = vpop.f32.mrf.mxu3 }
 0x342   : > { %v719_v57 = vpop.f32.mrf.mxu2 }
 0x34a   : > { %v803_v58 = vpop.f32.mrf.mxu2 }
 0x34b   : > { %v804_v59 = vadd.f32 %v1963_v38, %v803_v58 }
 0x34d   : > { %v830_v60 = vsel %vm511_vm2, %v804_v59, -inf }
 0x34e   : > { %831 = vmax.xlane.f32.xlu0 %v830_v60 }
 0x352   : > { %v805_v61 = vpop.f32.mrf.mxu2 }
 0x362   : > { %920 = vrot.lane.b32.xlu0 %v1941_v23, %s1758_s24 }
 0x37d   : > { %v618_v0 = vpop.f32.mrf.mxu3 }
 0x37e   : > { %v622_v1 = vpack.c.bf16 %v618_v0, %v597_v54 }
 0x380   : > { %1445 = vmatmul.msk.bf16.vlgmr.msra.gmra.mxu1 %vm511_vm2, %v622_v1 }
 0x385   : > { %v620_v2 = vpop.f32.mrf.mxu3 }
 0x38d   : > { %v738_v6 = vpop.f32.mrf.mxu3 }
 0x38e   : > { %v742_v7 = vpack.c.bf16 %v738_v6, %v717_v55 }
 0x390   : > { %1444 = vmatmul.msk.bf16.vlgmr.msra.gmra.mxu0 %vm511_vm2, %v742_v7 }
 0x391   : > { %960 = vmatpush.bf16.xpose.msra.mxu0 %v951_v8 }
 0x395   : > { %v740_v9 = vpop.f32.mrf.mxu3 }
 0x39d   : > { %v826_v10 = vpop.f32.mrf.mxu3 }
 0x39e   : > { %v827_v11 = vadd.f32 %v1972_v47, %v826_v10 }
 0x3a0   : > { %v833_v12 = vsel %vm511_vm2, %v827_v11, -inf }
 0x3a1   : > { %834 = vmax.xlane.f32.xlu2 %v833_v12 }
 0x3a5   : > { %v828_v23 = vpop.f32.mrf.mxu3 }
 0x3c1   : > { %v832_v14 = vpop.xlane.xlu0 %831 }
 0x3c2   : > { %v836_v15 = vsub.f32 %v804_v59, %v832_v14 }
 0x3c4   : > { %v838_v16 = vmul.f32 1.442695, %v836_v15 }
 0x3c6   : > { %1604 = vpow2.f32 %v838_v16 }
 0x3cc   : > { %v1605_v17 = vpop.eup %1604 }
 0x3cd   : > { %v842_v18 = vsel %vm511_vm2, %v1605_v17, 0.0 }
 0x3ce   : > { %843 = vadd.xlane.f32.xlu1 %v842_v18 }
 0x3d4   : > { %v921_v19 = vpop.permute.xlu0 %920 }
 0x3d5   : > { %1451 = vmatmul.msk.bf16.vlgmr.msra.gmra.mxu3 %vm511_vm2, %v921_v19 }
 0x3e7   : > { %943 = vrot.lane.b32.xlu1 %v1946_v25, %s1758_s24 }
 0x3ef   : > { %875 = vrot.lane.b32.xlu1 %v1939_v22, %s1756_s27 }
 0x3fd   : > { %v779_v20 = vpop.f32.mrf.mxu1 }
 0x405   : > { %v781_v61 = vpop.f32.mrf.mxu1 }
 0x40d   : > { %v759_v21 = vpop.f32.mrf.mxu0 }
 0x40e   : > { %v2026_v24 = vadd.f32 %v779_v20, %v759_v21 }
 0x414   : > { %v835_v26 = vpop.xlane.xlu2 %834 }
 0x415   : > { %v837_v27 = vsub.f32 %v827_v11, %v835_v26  ;;  %v761_v49 = vpop.f32.mrf.mxu0 }
 0x417   : > { %v840_v28 = vmul.f32 1.442695, %v837_v27 }
 0x419   : > { %1606 = vpow2.f32 %v840_v28 }
 0x41f   : > { %v1607_v29 = vpop.eup %1606 }
 0x420   : > { %v845_v30 = vsel %vm511_vm2, %v1607_v29, 0.0 }
 0x421   : > { %846 = vadd.xlane.f32.xlu0 %v845_v30 }
 0x435   : > { %1011 = vrot.lane.b32.xlu0 %v1939_v22, %s1759_s15 }
 0x441   : > { %v844_v25 = vpop.xlane.xlu1 %843 }
 0x442   : > { %1608 = vrcp.f32 %v844_v25 }
 0x448   : > { %v1609_v31 = vpop.eup %1608 }
 0x449   : > { %v850_v32 = vmul.f32 %v1609_v31, %v1605_v17 }
 0x44b   : > { %v852_v33 = vpack.c.bf16 %v850_v32, %v850_v32  ;;  %v782_v32 = vadd.f32 %v781_v61, %v761_v49 }
 0x44d   : > { %1448 = vmatmul.msk.bf16.vlgmr.msrb.gmra.mxu0 %vm511_vm2, %v852_v33 }
 0x458   : > { %v939_v34 = vpop.f32.mrf.mxu3 }
 0x459   : > { %v940_v35 = vadd.f32 %v1963_v38, %v939_v34  ;;  %v944_v36 = vpop.permute.xlu1 %943 }
 0x45b   : > { %v966_v37 = vsel %vm511_vm2, %v940_v35, -inf }
 0x45c   : > { %967 = vmax.xlane.f32.xlu2 %v966_v37 }
 0x45d   : > { %1452 = vmatmul.msk.bf16.vlgmr.msra.gmra.mxu0 %vm511_vm2, %v944_v36 }
 0x460   : > { %v941_v39 = vpop.f32.mrf.mxu3 }
 0x461   : > { %v876_v40 = vpop.permute.xlu1 %875 }
 0x462   : > { %v881_v22 = vsel %vm584_vm3, %v876_v40, 0 }
 0x463   : > { %890 = vmatpush.bf16.msrb.mxu1 %v881_v22 }
 0x494   : > { %v847_v43 = vpop.xlane.xlu0 %846 }
 0x495   : > { %1610 = vrcp.f32 %v847_v43 }
 0x49b   : > { %v1611_v44 = vpop.eup %1610 }
 0x49c   : > { %v851_v45 = vmul.f32 %v1611_v44, %v1607_v29  ;;  %v1581_v29 = vld [vmem:[%s1888_s9 + $0x1] ss:$0 sm:$0xff] }
 0x49e   : > { %v853_v38 = vpack.c.bf16 %v851_v45, %v851_v45 }
 0x4a0   : > { %1449 = vmatmul.msk.bf16.vlgmr.msrb.gmra.mxu1 %vm511_vm2, %v853_v38 }
 0x4a7   : > { %v1012_v46 = vpop.permute.xlu0 %1011 }
 0x4a8   : > { %v1017_v48 = vsel %vm584_vm3, %v1012_v46, 0 }
 0x4a9   : > { %1026 = vmatpush.bf16.msra.mxu2 %v1017_v48 }
 0x4ca   : > { %v871_v50 = vpop.f32.mrf.mxu0 }
 0x4cf   : > { %v968_v51 = vpop.xlane.xlu2 %967 }
 0x4d0   : > { %v972_v52 = vsub.f32 %v940_v35, %v968_v51 }
 0x4d2   : > { %v974_v53 = vmul.f32 1.442695, %v972_v52  ;;  %v873_v54 = vpop.f32.mrf.mxu0 }
 0x4d4   : > { %1612 = vpow2.f32 %v974_v53 }
 0x4da   : > { %v1613_v55 = vpop.eup %1612  ;;  %v962_v56 = vpop.f32.mrf.mxu0 }
 0x4db   : > { %v963_v57 = vadd.f32 %v1972_v47, %v962_v56  ;;  %v978_v58 = vsel %vm511_vm2, %v1613_v55, 0.0  ;;  %v1493_v56 = vld [vmem:[%s1907_s21 + $0x8] sm:$0xff] }
 0x4dc   : > { %979 = vadd.xlane.f32.xlu2 %v978_v58  ;;  %1145 = vmatpush.bf16.msrb.mxu0 %v1493_v56 }
 0x4dd   : > { %v969_v59 = vsel %vm511_vm2, %v963_v57, -inf }
 0x4de   : > { %970 = vmax.xlane.f32.xlu1 %v969_v59 }
 0x4e2   : > { %v964_v60 = vpop.f32.mrf.mxu0 }
 0x4e3   : > { %v1492_v60 = vld [vmem:[%s1907_s21] sm:$0xff] }
 0x4e4   : > { %1146 = vmatpush.bf16.msrb.mxu0 %v1492_v60 }
 0x51d   : > { %v892_v62 = vpop.f32.mrf.mxu1 }
 0x51e   : > { %v896_v63 = vpack.c.bf16 %v892_v62, %v871_v50 }
 0x520   : > { %1450 = vmatmul.msk.bf16.vlgmr.msrb.gmra.mxu2 %vm511_vm2, %v896_v63 }
 0x525   : > { %v894_v0 = vpop.f32.mrf.mxu1 }
 0x54f   : > { %v980_v9 = vpop.xlane.xlu2 %979 }
 0x551   : > { %v971_v1 = vpop.xlane.xlu1 %970 }
 0x552   : > { %v973_v2 = vsub.f32 %v963_v57, %v971_v1 }
 0x554   : > { %v976_v3 = vmul.f32 1.442695, %v973_v2 }
 0x556   : > { %1614 = vpow2.f32 %v976_v3 }
 0x557   : > { %1616 = vrcp.f32 %v980_v9 }
 0x55c   : > { %v1615_v6 = vpop.eup %1614 }
 0x55d   : > { %v981_v47 = vsel %vm511_vm2, %v1615_v6, 0.0  ;;  %v1617_v11 = vpop.eup %1616 }
 0x55e   : > { %982 = vadd.xlane.f32.xlu2 %v981_v47  ;;  %v986_v23 = vmul.f32 %v1617_v11, %v1613_v55 }
 0x560   : > { %v988_v18 = vpack.c.bf16 %v986_v23, %v986_v23  ;;  %v1582_v23 = vld [vmem:[%s1888_s9 + $0x2] ss:$0 sm:$0xff] }
 0x576   : > { %990 = vrot.lane.b32.xlu2 %v1935_v13, %s1759_s15  ;;  %v1033_v13 = vld [vmem:[%s1902_s14 + $0xc] sm:$0xf] }
 0x577   : > { %v1038_v19 = vsel %vm584_vm3, %v1033_v13, 0 }
 0x578   : > { %1047 = vmatpush.bf16.msrb.mxu3 %v1038_v19 }
 0x5a3   : > { %v913_v7 = vpop.f32.mrf.mxu2 }
 0x5a4   : > { %v918_v8 = vadd.f32 %v913_v7, %v2026_v24 }
 0x5ab   : > { %v915_v20 = vpop.f32.mrf.mxu2 }
 0x5ac   : > { %v919_v34 = vadd.f32 %v915_v20, %v782_v32 }
 0x5d1   : > { %v983_v10 = vpop.xlane.xlu2 %982 }
 0x5d2   : > { %1618 = vrcp.f32 %v983_v10 }
 0x5d3   : > { %1620 = vrcp.f32 %v1760_v41 }
 0x5d8   : > { %v1619_v12 = vpop.eup %1618 }
 0x5d9   : > { %v987_v14 = vmul.f32 %v1619_v12, %v1615_v6  ;;  %v991_v15 = vpop.permute.xlu2 %990  ;;  %v1621_v42 = vpop.eup %1620 }
 0x5da   : > { %v996_v16 = vsel %vm584_vm3, %v991_v15, 0  ;;  %v1068_v43 = vmul.f32 32.0, %v1621_v42  ;;  %vm1072_vm4 = vweird.f32 %v1621_v42 }
 0x5db   : > { %v989_v17 = vpack.c.bf16 %v987_v14, %v987_v14  ;;  %1005 = vmatpush.bf16.msra.mxu1 %v996_v16 }
 0x5dc   : > { %v1069_v44 = vsub.f32 1.0, %v1068_v43 }
 0x5dd   : > { %1454 = vmatmul.msk.bf16.vlgmr.msra.gmra.mxu2 %vm511_vm2, %v989_v17  ;;  %v1583_v17 = vld [vmem:[%s1888_s9 + $0x3] ss:$0 sm:$0xff] }
 0x5de   : > { %1453 = vmatmul.msk.bf16.vlgmr.msra.gmra.mxu1 %vm511_vm2, %v988_v18  ;;  %v1070_v45 = vmul.f32 %v1621_v42, %v1069_v44 }
 0x65b   : > { %v1007_v21 = vpop.f32.mrf.mxu1 }
 0x660   : > { %v1028_v24 = vpop.f32.mrf.mxu2 }
 0x661   : > { %v1032_v26 = vpack.c.bf16 %v1028_v24, %v1007_v21 }
 0x663   : > { %v1009_v27 = vpop.f32.mrf.mxu1  ;;  %1455 = vmatmul.msk.bf16.vlgmr.msrb.gmra.mxu3 %vm511_vm2, %v1032_v26  ;;  %v1497_v26 = vld [vmem:[%s1912_s23 + $0x18] sm:$0xff] }
 0x664   : > { %1197 = vmatpush.bf16.msrb.mxu1 %v1497_v26  ;;  %v1496_v27 = vld [vmem:[%s1912_s23 + $0x10] sm:$0xff] }
 0x668   : > { %v1030_v28 = vpop.f32.mrf.mxu2  ;;  %1198 = vmatpush.bf16.msrb.mxu1 %v1496_v27 }
 0x669   : > { %v1495_v28 = vld [vmem:[%s1912_s23 + $0x8] sm:$0xff] }
 0x66c   : > { %1199 = vmatpush.bf16.msrb.mxu1 %v1495_v28 }
 0x6e6   : > { %v1049_v30 = vpop.f32.mrf.mxu3 }
 0x6e7   : > { %v1054_v25 = vadd.f32 %v1049_v30, %v918_v8 }
 0x6e9   : > { %v1057_v31 = vadd.f32 %v1581_v29, %v1054_v25  ;;  %v1584_v25 = vld [vmem:[%s1888_s9 + $0x4] ss:$0 sm:$0xff] }
 0x6eb   : > { %v1059_v33 = vadd.f32 %v1057_v31, %v1924_v4  ;;  %v1071_v4 = vadd.f32 %v1621_v42, %v1070_v45 }
 0x6ed   : > { %v1061_v35 = vsel %vm474_vm1, %v1059_v33, 0.0  ;;  %v2059_v38 = vsel %vm1072_vm4, %v1621_v42, %v1071_v4 }
 0x6ee   : > { %1062 = vadd.xlane.f32.xlu1 %v1061_v35  ;;  %v1051_v36 = vpop.f32.mrf.mxu3 }
 0x6ef   : > { %v1055_v37 = vadd.f32 %v1051_v36, %v919_v34 }
 0x6f1   : > { %v1058_v39 = vadd.f32 %v1581_v29, %v1055_v37  ;;  %v1494_v29 = vld [vmem:[%s1912_s23] sm:$0xff]  ;;  %v1585_v37 = vld [vmem:[%s1888_s9 + $0x5] ss:$0 sm:$0xff] }
 0x6f2   : > { %1200 = vmatpush.bf16.msrb.mxu1 %v1494_v29 }
 0x6f3   : > { %v1060_v40 = vadd.f32 %v1058_v39, %v1929_v5 }
 0x6f5   : > { %v1064_v22 = vsel %vm474_vm1, %v1060_v40, 0.0 }
 0x6f6   : > { %1065 = vadd.xlane.f32.xlu0 %v1064_v22 }
 0x761   : > { %v1063_v46 = vpop.xlane.xlu1 %1062 }
 0x762   : > { %v1074_v48 = vmul.f32 %v2059_v38, %v1063_v46 }
 0x764   : > { %v1076_v49 = vsub.f32 %v1059_v33, %v1074_v48 }
 0x766   : > { %v1078_v5 = vmul.f32 %v1076_v49, %v1076_v49 }
 0x768   : > { %v1080_v50 = vsel %vm474_vm1, %v1078_v5, 0.0 }
 0x769   : > { %1081 = vadd.xlane.f32.xlu1 %v1080_v50  ;;  %v1066_v51 = vpop.xlane.xlu0 %1065 }
 0x76a   : > { %v1075_v52 = vmul.f32 %v2059_v38, %v1066_v51 }
 0x76c   : > { %v1077_v53 = vsub.f32 %v1060_v40, %v1075_v52 }
 0x76e   : > { %v1079_v54 = vmul.f32 %v1077_v53, %v1077_v53 }
 0x770   : > { %v1083_v55 = vsel %vm474_vm1, %v1079_v54, 0.0 }
 0x771   : > { %1084 = vadd.xlane.f32.xlu1 %v1083_v55 }
 0x7dc   : > { %v1082_v57 = vpop.xlane.xlu1 %1081 }
 0x7dd   : > { %v1086_v58 = vmul.f32 %v1082_v57, %v2059_v38 }
 0x7df   : > { %v1088_v59 = vadd.f32 1e-05, %v1086_v58 }
 0x7e1   : > { %1622 = vrsqrt.f32 %v1088_v59  ;;  %vm1096_vm6 = vweird.f32 %v1088_v59 }
 0x7e4   : > { %v1085_v61 = vpop.xlane.xlu1 %1084 }
 0x7e5   : > { %v1087_v62 = vmul.f32 %v1085_v61, %v2059_v38 }
 0x7e7   : > { %v1623_v63 = vpop.eup %1622  ;;  %v1089_v0 = vadd.f32 1e-05, %v1087_v62 }
 0x7e8   : > { %v1091_v1 = vmul.f32 %v1623_v63, %v1088_v59  ;;  %vm1097_vm5 = vweird.f32 %v1623_v63 }
 0x7e9   : > { %1624 = vrsqrt.f32 %v1089_v0  ;;  %vm1098_vm7 = vmor %vm1096_vm6, %vm1097_vm5  ;;  %vm1106_vm9 = vweird.f32 %v1089_v0 }
 0x7ea   : > { %v1092_v2 = vmul.f32 %v1623_v63, %v1091_v1 }
 0x7ec   : > { %v1093_v3 = vmul.f32 0.5, %v1092_v2 }
 0x7ee   : > { %v1094_v6 = vsub.f32 1.5, %v1093_v3 }
 0x7ef   : > { %v1625_v47 = vpop.eup %1624 }
 0x7f0   : > { %v1095_v7 = vmul.f32 %v1623_v63, %v1094_v6  ;;  %v1101_v8 = vmul.f32 %v1625_v47, %v1089_v0  ;;  %vm1107_vm8 = vweird.f32 %v1625_v47 }
 0x7f1   : > { %vm1108_vm10 = vmor %vm1106_vm9, %vm1107_vm8 }
 0x7f2   : > { %v1102_v9 = vmul.f32 %v1625_v47, %v1101_v8  ;;  %v1099_v10 = vsel %vm1098_vm7, %v1623_v63, %v1095_v7 }
 0x7f3   : > { %v1110_v14 = vmul.f32 %v1099_v10, %v1076_v49 }
 0x7f4   : > { %v1103_v11 = vmul.f32 0.5, %v1102_v9  ;;  %v1587_v9 = vld [vmem:[%s1888_s9 + $0x7] ss:$0 sm:$0xff] }
 0x7f5   : > { %v1113_v18 = vmul.f32 %v1582_v23, %v1110_v14 }
 0x7f6   : > { %v1104_v12 = vsub.f32 1.5, %v1103_v11 }
 0x7f7   : > { %v1116_v20 = vadd.f32 %v1583_v17, %v1113_v18 }
 0x7f8   : > { %v1105_v15 = vmul.f32 %v1625_v47, %v1104_v12 }
 0x7fa   : > { %v1109_v16 = vsel %vm1108_vm10, %v1625_v47, %v1105_v15  ;;  %v1586_v47 = vld [vmem:[%s1888_s9 + $0x6] ss:$0 sm:$0xff] }
 0x7fb   : > { %v1111_v13 = vmul.f32 %v1109_v16, %v1077_v53 }
 0x7fd   : > { %v1114_v19 = vmul.f32 %v1582_v23, %v1111_v13 }
 0x7ff   : > { %v1117_v21 = vadd.f32 %v1583_v17, %v1114_v19 }
 0x801   : > { %v1118_v24 = vpack.c.bf16 %v1117_v21, %v1116_v20 }
 0x803   : > { %1464 = vmatmul.msk.bf16.vlgmr.msrb.gmra.mxu0 %vm474_vm1, %v1118_v24 }
 0x880   : > { %v1148_v30 = vpop.f32.mrf.mxu0 }
 0x881   : > { %v1149_v31 = vadd.f32 %v1584_v25, %v1148_v30 }
 0x883   : > { %v1153_v34 = vmax.f32 %v1149_v31, 0.0 }
 0x888   : > { %v1150_v32 = vpop.f32.mrf.mxu0 }
 0x889   : > { %v1151_v33 = vadd.f32 %v1584_v25, %v1150_v32 }
 0x88b   : > { %v1154_v35 = vmax.f32 %v1151_v33, 0.0 }
 0x88d   : > { %v1155_v36 = vpack.c.bf16 %v1154_v35, %v1153_v34 }
 0x88f   : > { %1481 = vmatmul.msk.bf16.vlgmr.msrb.gmra.mxu1 %vm1189_vm11, %v1155_v36 }
 0x90c   : > { %v1202_v39 = vpop.f32.mrf.mxu1 }
 0x90d   : > { %v1203_v40 = vadd.f32 %v1585_v37, %v1202_v39 }
 0x90f   : > { %v1207_v22 = vadd.f32 %v1203_v40, %v1116_v20 }
 0x911   : > { %v1209_v41 = vsel %vm474_vm1, %v1207_v22, 0.0 }
 0x912   : > { %1210 = vadd.xlane.f32.xlu2 %v1209_v41 }
 0x914   : > { %v1204_v42 = vpop.f32.mrf.mxu1 }
 0x915   : > { %v1205_v43 = vadd.f32 %v1585_v37, %v1204_v42 }
 0x917   : > { %v1208_v44 = vadd.f32 %v1205_v43, %v1117_v21 }
 0x919   : > { %v1212_v45 = vsel %vm474_vm1, %v1208_v44, 0.0 }
 0x91a   : > { %1213 = vadd.xlane.f32.xlu1 %v1212_v45 }
 0x985   : > { %v1211_v4 = vpop.xlane.xlu2 %1210 }
 0x986   : > { %v1215_v46 = vmul.f32 %v1211_v4, %v2059_v38 }
 0x988   : > { %v1217_v48 = vsub.f32 %v1207_v22, %v1215_v46 }
 0x98a   : > { %v1219_v49 = vmul.f32 %v1217_v48, %v1217_v48 }
 0x98c   : > { %v1221_v5 = vsel %vm474_vm1, %v1219_v49, 0.0 }
 0x98d   : > { %v1214_v50 = vpop.xlane.xlu1 %1213  ;;  %1222 = vadd.xlane.f32.xlu1 %v1221_v5 }
 0x98e   : > { %v1216_v51 = vmul.f32 %v1214_v50, %v2059_v38 }
 0x990   : > { %v1218_v52 = vsub.f32 %v1208_v44, %v1216_v51 }
 0x992   : > { %v1220_v53 = vmul.f32 %v1218_v52, %v1218_v52 }
 0x994   : > { %v1224_v54 = vsel %vm474_vm1, %v1220_v53, 0.0 }
 0x995   : > { %1225 = vadd.xlane.f32.xlu1 %v1224_v54 }
 0xa00   : > { %v1223_v55 = vpop.xlane.xlu1 %1222 }
 0xa01   : > { %v1227_v56 = vmul.f32 %v1223_v55, %v2059_v38 }
 0xa03   : > { %v1229_v57 = vadd.f32 1e-05, %v1227_v56 }
 0xa05   : > { %1626 = vrsqrt.f32 %v1229_v57  ;;  %vm1237_vm13 = vweird.f32 %v1229_v57 }
 0xa08   : > { %v1226_v58 = vpop.xlane.xlu1 %1225 }
 0xa09   : > { %v1228_v59 = vmul.f32 %v1226_v58, %v2059_v38 }
 0xa0b   : > { %v1627_v60 = vpop.eup %1626  ;;  %v1230_v61 = vadd.f32 1e-05, %v1228_v59 }
 0xa0c   : > { %v1232_v62 = vmul.f32 %v1627_v60, %v1229_v57  ;;  %vm1238_vm12 = vweird.f32 %v1627_v60 }
 0xa0d   : > { %1628 = vrsqrt.f32 %v1230_v61  ;;  %vm1239_vm14 = vmor %vm1237_vm13, %vm1238_vm12  ;;  %vm1247_vm0 = vweird.f32 %v1230_v61 }
 0xa0e   : > { %v1233_v63 = vmul.f32 %v1627_v60, %v1232_v62 }
 0xa10   : > { %v1234_v0 = vmul.f32 0.5, %v1233_v63 }
 0xa12   : > { %v1235_v1 = vsub.f32 1.5, %v1234_v0 }
 0xa13   : > { %v1629_v2 = vpop.eup %1628 }
 0xa14   : > { %v1236_v3 = vmul.f32 %v1627_v60, %v1235_v1  ;;  %v1242_v6 = vmul.f32 %v1629_v2, %v1230_v61  ;;  %vm1248_vm15 = vweird.f32 %v1629_v2 }
 0xa15   : > { %vm1249_vm2 = vmor %vm1247_vm0, %vm1248_vm15 }
 0xa16   : > { %v1240_v7 = vsel %vm1239_vm14, %v1627_v60, %v1236_v3  ;;  %v1243_v8 = vmul.f32 %v1629_v2, %v1242_v6 }
 0xa17   : > { %v1251_v10 = vmul.f32 %v1240_v7, %v1217_v48 }
 0xa18   : > { %v1244_v38 = vmul.f32 0.5, %v1243_v8 }
 0xa19   : > { %v1254_v11 = vmul.f32 %v1586_v47, %v1251_v10 }
 0xa1a   : > { %v1245_v12 = vsub.f32 1.5, %v1244_v38 }
 0xa1b   : > { %v1257_v23 = vadd.f32 %v1587_v9, %v1254_v11 }
 0xa1c   : > { %v1246_v14 = vmul.f32 %v1629_v2, %v1245_v12 }
 0xa1d   : > { %1259 = vst.msk [vmem:[%s2121_s7] sm:$0xff] %vm474_vm1, %v1257_v23 }
 0xa1e   : > { %v1250_v15 = vsel %vm1249_vm2, %v1629_v2, %v1246_v14 }
 0xa1f   : > { %v1252_v16 = vmul.f32 %v1250_v15, %v1218_v52 }
 0xa21   : > { %v1255_v17 = vmul.f32 %v1586_v47, %v1252_v16 }
 0xa23   : > { %v1258_v18 = vadd.f32 %v1587_v9, %v1255_v17 }
 0xa25   : > { %1260 = vst.msk [vmem:[%s2121_s7 + $0x8] sm:$0xff] %vm474_vm1, %v1258_v18 }
 0xa26 PF: > { %s21_s29 = sadd.s32 1, %s1744_s29   ;;  %s2126_s24 = smov %s1728_s25 }
 0xa27   : > { %p18_p3 = scmp.ge.s32.totalorder %s21_s29, 4   ;;  %s2127_s25 = smov %s1732_s26 }
 0xa28   : > { %s2128_s26 = smov %s1873_s30  ;;  %s2129_s27 = smov %s1740_s28 }
 0xa29   : > { %s2130_s28 = smov %s2132_s17  ;;  %20 = sbr.rel (!%p18_p3) target bundleno = 5 (0x5), region = 113 }
 0xa2e   :  { %1283 = vsyncpa [#allocation3], 1 }
 0xa2f   :  { %1285 = vsyncpa [#allocation3 + $0x1], 1 }
 0xa30   :  { %1286 = vsyncpa [#allocation5], 1 }
 0xa31   :  { %1288 = vsyncpa [#allocation5 + $0x1], 1 }

</bundles_post_ra>
